<compile_context>
chip_gen: v7x
topology: tpu7x:2x2x1
jax: 0.10.0
libtpu: 0.0.40
codegen_flags: <defaults>
</compile_context>

<pallas_src>
import functools

import jax
import jax.numpy as jnp
from jax import lax
from jax.experimental import pallas as pl
from jax.experimental.pallas import tpu as pltpu


_VMEM = pl.BlockSpec(memory_space=pltpu.MemorySpace.VMEM)


# ----------------------------------------------------------------------------
# Fused kernel factory.
#   inputs : x (N, D),
#            per layer l: wih_cat_l (d_in, 8H), whh_f_l (H, 4H),
#                         whh_b_l (H, 4H),      b_cat_l (1, 8H)
#   outputs: support_out (S, 2H), query_out (Q, 2H)
# Gate layout along the 8H axis: [i_f f_f g_f o_f | i_b f_b g_b o_b].
# ----------------------------------------------------------------------------
def _make_fused_bilstm_kernel(num_layers, S, Q, H):
    G4 = 4 * H
    G8 = 8 * H
    N = S + Q

    def kernel(*refs):
        x_ref = refs[0]
        layer_refs = refs[1:1 + 4 * num_layers]
        sup_out_ref = refs[1 + 4 * num_layers]
        qry_out_ref = refs[2 + 4 * num_layers]

        # Row index mask used for lane-dense register accumulation of the
        # per-step hidden states (avoids per-step 1xH masked stores).
        row_iota = lax.broadcasted_iota(jnp.int32, (S, H), 0)

        # Per-layer activations carried in registers (never hit HBM).
        sup_f = sup_b = q_f = q_b = None

        for layer in range(num_layers):
            wih_ref, whhf_ref, whhb_ref, bcat_ref = layer_refs[4 * layer:4 * layer + 4]
            whh_f = whhf_ref[...]          # (H, 4H) loaded once per layer
            whh_b = whhb_ref[...]
            b_cat = bcat_ref[...]          # (1, 8H)

            # ---- input contribution for every row (support + query), both
            # directions, in one lane-dense MXU op.
            if layer == 0:
                pre = jnp.dot(x_ref[...], wih_ref[...],
                              preferred_element_type=jnp.float32) + b_cat
                sup_pre = pre[0:S, :]      # (S, 8H)
                q_pre = pre[S:N, :]        # (Q, 8H)
            else:
                # Layer input is [fw | bw]; split the weight instead of
                # concatenating the data (keeps everything lane-aligned).
                w_top = wih_ref[0:H, :]
                w_bot = wih_ref[H:2 * H, :]
                sup_pre = (jnp.dot(sup_f, w_top, preferred_element_type=jnp.float32)
                           + jnp.dot(sup_b, w_bot, preferred_element_type=jnp.float32)
                           + b_cat)
                q_pre = (jnp.dot(q_f, w_top, preferred_element_type=jnp.float32)
                         + jnp.dot(q_b, w_bot, preferred_element_type=jnp.float32)
                         + b_cat)

            # ---- support recurrence: fw and bw chains interleaved, fully
            # unrolled (S is small and static).
            h_f = jnp.zeros((1, H), jnp.float32)
            c_f = jnp.zeros((1, H), jnp.float32)
            h_b = jnp.zeros((1, H), jnp.float32)
            c_b = jnp.zeros((1, H), jnp.float32)
            out_f = jnp.zeros((S, H), jnp.float32)
            out_b = jnp.zeros((S, H), jnp.float32)

            for t in range(S):
                gf = sup_pre[t:t + 1, 0:G4] + jnp.dot(
                    h_f, whh_f, preferred_element_type=jnp.float32)
                gb = sup_pre[S - 1 - t:S - t, G4:G8] + jnp.dot(
                    h_b, whh_b, preferred_element_type=jnp.float32)

                # One sigmoid over the whole 4H block per direction (i,f,o
                # slices are valid), one tanh on the g slice.
                sf = jax.nn.sigmoid(gf)
                sb = jax.nn.sigmoid(gb)
                gf_g = jnp.tanh(gf[:, 2 * H:3 * H])
                gb_g = jnp.tanh(gb[:, 2 * H:3 * H])

                c_f = sf[:, H:2 * H] * c_f + sf[:, 0:H] * gf_g
                c_b = sb[:, H:2 * H] * c_b + sb[:, 0:H] * gb_g
                h_f = sf[:, 3 * H:4 * H] * jnp.tanh(c_f)
                h_b = sb[:, 3 * H:4 * H] * jnp.tanh(c_b)

                # Register accumulation of the per-position outputs
                # (forward fills row t, backward fills row S-1-t).
                out_f = jnp.where(row_iota == t,
                                  jnp.broadcast_to(h_f, (S, H)), out_f)
                out_b = jnp.where(row_iota == (S - 1 - t),
                                  jnp.broadcast_to(h_b, (S, H)), out_b)

            # Support-final states of this layer (h_f/c_f after position S-1,
            # h_b/c_b after position 0) — exactly PyTorch's h_n / c_n.

            # ---- query step: all Q queries at once, both directions; the
            # constant h0 @ W_hh term is a per-direction bias row.
            hhq_f = jnp.dot(h_f, whh_f, preferred_element_type=jnp.float32)
            hhq_b = jnp.dot(h_b, whh_b, preferred_element_type=jnp.float32)
            qg_f = q_pre[:, 0:G4] + hhq_f
            qg_b = q_pre[:, G4:G8] + hhq_b
            sqf = jax.nn.sigmoid(qg_f)
            sqb = jax.nn.sigmoid(qg_b)
            gq_f = jnp.tanh(qg_f[:, 2 * H:3 * H])
            gq_b = jnp.tanh(qg_b[:, 2 * H:3 * H])
            cq_f = sqf[:, H:2 * H] * c_f + sqf[:, 0:H] * gq_f
            cq_b = sqb[:, H:2 * H] * c_b + sqb[:, 0:H] * gq_b
            q_f_new = sqf[:, 3 * H:4 * H] * jnp.tanh(cq_f)
            q_b_new = sqb[:, 3 * H:4 * H] * jnp.tanh(cq_b)

            sup_f, sup_b = out_f, out_b
            q_f, q_b = q_f_new, q_b_new

        # Bulk stores of the last layer's outputs (fw in columns [0:H],
        # bw in columns [H:2H]), done once at the very end.
        sup_out_ref[:, 0:H] = sup_f
        sup_out_ref[:, H:2 * H] = sup_b
        qry_out_ref[:, 0:H] = q_f
        qry_out_ref[:, H:2 * H] = q_b

    return kernel


# ----------------------------------------------------------------------------
# Parameter construction (deterministic, PyTorch-like uniform(-1/sqrt(H), +)).
# layer_size: list -> hidden = layer_size[0], num_layers = len(layer_size)
# ----------------------------------------------------------------------------
def init_bilstm_params(key, vector_dim, layer_size):
    H = layer_size[0]
    num_layers = len(layer_size)
    bound = 1.0 / jnp.sqrt(jnp.float32(H))
    params = []
    for layer in range(num_layers):
        d_in = vector_dim if layer == 0 else 2 * H
        layer_p = {}
        for direction in ("fw", "bw"):
            key, k1, k2, k3, k4 = jax.random.split(key, 5)
            wih = jax.random.uniform(k1, (d_in, 4 * H), jnp.float32, -bound, bound)
            whh = jax.random.uniform(k2, (H, 4 * H), jnp.float32, -bound, bound)
            b_ih = jax.random.uniform(k3, (1, 4 * H), jnp.float32, -bound, bound)
            b_hh = jax.random.uniform(k4, (1, 4 * H), jnp.float32, -bound, bound)
            layer_p[direction] = (wih, whh, b_ih + b_hh)
        params.append(layer_p)
    return params


# ----------------------------------------------------------------------------
# Forward pass matching BidirectionalLSTM.forward(input, way, shot):
# one fused pallas_call for the whole thing.
# ----------------------------------------------------------------------------
def bidirectional_lstm_forward(x, params, hidden_size, way, shot):
    H = hidden_size
    S = way * shot
    N = x.shape[0]
    Q = N - S
    num_layers = len(params)

    flat_inputs = [x]
    for lp in params:
        wih_f, whh_f, b_f = lp["fw"]
        wih_b, whh_b, b_b = lp["bw"]
        wih_cat = jnp.concatenate([wih_f, wih_b], axis=1)   # (d_in, 8H)
        b_cat = jnp.concatenate([b_f, b_b], axis=1)         # (1, 8H)
        flat_inputs += [wih_cat, whh_f, whh_b, b_cat]

    kernel = _make_fused_bilstm_kernel(num_layers, S, Q, H)
    out_shape = (jax.ShapeDtypeStruct((S, 2 * H), jnp.float32),
                 jax.ShapeDtypeStruct((Q, 2 * H), jnp.float32))
    support_out, query_out = pl.pallas_call(
        kernel,
        out_shape=out_shape,
        in_specs=[_VMEM] * len(flat_inputs),
        out_specs=(_VMEM, _VMEM),
    )(*flat_inputs)
    return support_out, query_out


# ----------------------------------------------------------------------------
# Pure-JAX reference (mirrors the PyTorch module) for correctness checking.
# ----------------------------------------------------------------------------
def _ref_cell(x_rows, h, c, wih, whh, b, H):
    gates = (jnp.dot(x_rows, wih, precision=lax.Precision.HIGHEST)
             + jnp.dot(h, whh, precision=lax.Precision.HIGHEST) + b)
    i = jax.nn.sigmoid(gates[:, 0:H])
    f = jax.nn.sigmoid(gates[:, H:2 * H])
    g = jnp.tanh(gates[:, 2 * H:3 * H])
    o = jax.nn.sigmoid(gates[:, 3 * H:4 * H])
    c_new = f * c + i * g
    h_new = o * jnp.tanh(c_new)
    return h_new, c_new


def ref_forward(x, params, hidden_size, way, shot):
    H = hidden_size
    S = way * shot
    support, query = x[:S], x[S:]
    zeros = jnp.zeros((1, H), jnp.float32)

    inp = support
    finals = []
    for lp in params:
        wih_f, whh_f, b_f = lp["fw"]
        wih_b, whh_b, b_b = lp["bw"]
        h, c = zeros, zeros
        outs_f = []
        for t in range(S):
            h, c = _ref_cell(inp[t:t + 1], h, c, wih_f, whh_f, b_f, H)
            outs_f.append(h)
        hT_f, cT_f = h, c
        h, c = zeros, zeros
        outs_b = [None] * S
        for t in range(S):
            h, c = _ref_cell(inp[S - 1 - t:S - t], h, c, wih_b, whh_b, b_b, H)
            outs_b[S - 1 - t] = h
        hT_b, cT_b = h, c
        inp = jnp.concatenate([jnp.concatenate(outs_f, axis=0),
                               jnp.concatenate(outs_b, axis=0)], axis=1)
        finals.append(((hT_f, cT_f), (hT_b, cT_b)))
    support_out = inp

    qinp = query
    for lp, ((hT_f, cT_f), (hT_b, cT_b)) in zip(params, finals):
        wih_f, whh_f, b_f = lp["fw"]
        wih_b, whh_b, b_b = lp["bw"]
        hq_f, _ = _ref_cell(qinp, hT_f, cT_f, wih_f, whh_f, b_f, H)
        hq_b, _ = _ref_cell(qinp, hT_b, cT_b, wih_b, whh_b, b_b, H)
        qinp = jnp.concatenate([hq_f, hq_b], axis=1)
    return support_out, qinp


if __name__ == "__main__":
    # Module config: BidirectionalLSTM(layer_size=[32], vector_dim=64)
    layer_size = [32]
    hidden_size = layer_size[0]
    vector_dim = 64
    way, shot = 2, 4          # support = 8
    num_query = 4             # total input rows = 12

    key = jax.random.PRNGKey(0)
    key, pkey, xkey = jax.random.split(key, 3)
    params = init_bilstm_params(pkey, vector_dim, layer_size)
    x = jax.random.normal(xkey, (way * shot + num_query, vector_dim), jnp.float32)

    fwd = jax.jit(functools.partial(bidirectional_lstm_forward,
                                    hidden_size=hidden_size, way=way, shot=shot))
    support_out, query_out = fwd(x, params)
    jax.block_until_ready((support_out, query_out))

    ref_sup, ref_qry = ref_forward(x, params, hidden_size, way, shot)

    assert support_out.shape == (way * shot, 2 * hidden_size)
    assert query_out.shape == (num_query, 2 * hidden_size)
    assert bool(jnp.all(jnp.isfinite(support_out)))
    assert bool(jnp.all(jnp.isfinite(query_out)))
    assert bool(jnp.allclose(support_out, ref_sup, atol=1e-2, rtol=1e-2))
    assert bool(jnp.allclose(query_out, ref_qry, atol=1e-2, rtol=1e-2))
    print("KERNEL_OK")
</pallas_src>

<mosaic_0001>
module attributes {stable_mosaic.version = 11 : i64} {
  func.func @kernel(%arg0: memref<12x64xf32, #tpu.memory_space<vmem>>, %arg1: memref<64x256xf32, #tpu.memory_space<vmem>>, %arg2: memref<32x128xf32, #tpu.memory_space<vmem>>, %arg3: memref<32x128xf32, #tpu.memory_space<vmem>>, %arg4: memref<1x256xf32, #tpu.memory_space<vmem>>, %arg5: memref<8x64xf32, #tpu.memory_space<vmem>>, %arg6: memref<4x64xf32, #tpu.memory_space<vmem>>) attributes {dimension_semantics = [], scalar_prefetch = 0 : i64, scratch_operands = 0 : i64, tpu.core_type = #tpu.core_type<tc>} {
    %0 = tpu.iota {dimensions = array<i32: 0>} : vector<8x32xi32>
    %c0 = arith.constant 0 : index
    %c0_0 = arith.constant 0 : index
    %1 = vector.load %arg2[%c0, %c0_0] : memref<32x128xf32, #tpu.memory_space<vmem>>, vector<32x128xf32>
    %c0_1 = arith.constant 0 : index
    %c0_2 = arith.constant 0 : index
    %2 = vector.load %arg3[%c0_1, %c0_2] : memref<32x128xf32, #tpu.memory_space<vmem>>, vector<32x128xf32>
    %c0_3 = arith.constant 0 : index
    %c0_4 = arith.constant 0 : index
    %3 = vector.load %arg4[%c0_3, %c0_4] : memref<1x256xf32, #tpu.memory_space<vmem>>, vector<1x256xf32>
    %c0_5 = arith.constant 0 : index
    %c0_6 = arith.constant 0 : index
    %4 = vector.load %arg0[%c0_5, %c0_6] : memref<12x64xf32, #tpu.memory_space<vmem>>, vector<12x64xf32>
    %c0_7 = arith.constant 0 : index
    %c0_8 = arith.constant 0 : index
    %5 = vector.load %arg1[%c0_7, %c0_8] : memref<64x256xf32, #tpu.memory_space<vmem>>, vector<64x256xf32>
    %cst = arith.constant dense<0.000000e+00> : vector<12x256xf32>
    %6 = tpu.matmul %4, %5, %cst {dimension_numbers = #tpu.dot_dimension_numbers<[1], [0], [0], [1], [0, 0, 1, 1], [], []>} : vector<12x64xf32>, vector<64x256xf32>, vector<12x256xf32> -> vector<12x256xf32>
    %7 = vector.broadcast %3 : vector<1x256xf32> to vector<12x256xf32>
    %8 = arith.addf %6, %7 : vector<12x256xf32>
    %9 = vector.extract_strided_slice %8 {offsets = [0, 0], sizes = [8, 256], strides = [1, 1]} : vector<12x256xf32> to vector<8x256xf32>
    %10 = vector.extract_strided_slice %8 {offsets = [8, 0], sizes = [4, 256], strides = [1, 1]} : vector<12x256xf32> to vector<4x256xf32>
    %cst_9 = arith.constant 0.000000e+00 : f32
    %11 = vector.broadcast %cst_9 : f32 to vector<1x32xf32>
    %cst_10 = arith.constant 0.000000e+00 : f32
    %12 = vector.broadcast %cst_10 : f32 to vector<1x32xf32>
    %cst_11 = arith.constant 0.000000e+00 : f32
    %13 = vector.broadcast %cst_11 : f32 to vector<1x32xf32>
    %cst_12 = arith.constant 0.000000e+00 : f32
    %14 = vector.broadcast %cst_12 : f32 to vector<1x32xf32>
    %cst_13 = arith.constant 0.000000e+00 : f32
    %15 = vector.broadcast %cst_13 : f32 to vector<8x32xf32>
    %cst_14 = arith.constant 0.000000e+00 : f32
    %16 = vector.broadcast %cst_14 : f32 to vector<8x32xf32>
    %17 = vector.extract_strided_slice %9 {offsets = [0, 0], sizes = [1, 128], strides = [1, 1]} : vector<8x256xf32> to vector<1x128xf32>
    %cst_15 = arith.constant dense<0.000000e+00> : vector<1x128xf32>
    %18 = tpu.matmul %11, %1, %cst_15 {dimension_numbers = #tpu.dot_dimension_numbers<[1], [0], [0], [1], [0, 0, 1, 1], [], []>} : vector<1x32xf32>, vector<32x128xf32>, vector<1x128xf32> -> vector<1x128xf32>
    %19 = arith.addf %17, %18 : vector<1x128xf32>
    %20 = vector.extract_strided_slice %9 {offsets = [7, 128], sizes = [1, 128], strides = [1, 1]} : vector<8x256xf32> to vector<1x128xf32>
    %cst_16 = arith.constant dense<0.000000e+00> : vector<1x128xf32>
    %21 = tpu.matmul %13, %2, %cst_16 {dimension_numbers = #tpu.dot_dimension_numbers<[1], [0], [0], [1], [0, 0, 1, 1], [], []>} : vector<1x32xf32>, vector<32x128xf32>, vector<1x128xf32> -> vector<1x128xf32>
    %22 = arith.addf %20, %21 : vector<1x128xf32>
    %23 = arith.negf %19 : vector<1x128xf32>
    %24 = math.exp %23 : vector<1x128xf32>
    %cst_17 = arith.constant 1.000000e+00 : f32
    %25 = vector.broadcast %cst_17 : f32 to vector<1x128xf32>
    %26 = arith.addf %25, %24 : vector<1x128xf32>
    %27 = arith.divf %25, %26 : vector<1x128xf32>
    %28 = arith.negf %22 : vector<1x128xf32>
    %29 = math.exp %28 : vector<1x128xf32>
    %cst_18 = arith.constant 1.000000e+00 : f32
    %30 = vector.broadcast %cst_18 : f32 to vector<1x128xf32>
    %31 = arith.addf %30, %29 : vector<1x128xf32>
    %32 = arith.divf %30, %31 : vector<1x128xf32>
    %33 = vector.extract_strided_slice %19 {offsets = [0, 64], sizes = [1, 32], strides = [1, 1]} : vector<1x128xf32> to vector<1x32xf32>
    %34 = math.tanh %33 : vector<1x32xf32>
    %35 = vector.extract_strided_slice %22 {offsets = [0, 64], sizes = [1, 32], strides = [1, 1]} : vector<1x128xf32> to vector<1x32xf32>
    %36 = math.tanh %35 : vector<1x32xf32>
    %37 = vector.extract_strided_slice %27 {offsets = [0, 32], sizes = [1, 32], strides = [1, 1]} : vector<1x128xf32> to vector<1x32xf32>
    %38 = arith.mulf %37, %12 : vector<1x32xf32>
    %39 = vector.extract_strided_slice %27 {offsets = [0, 0], sizes = [1, 32], strides = [1, 1]} : vector<1x128xf32> to vector<1x32xf32>
    %40 = arith.mulf %39, %34 : vector<1x32xf32>
    %41 = arith.addf %38, %40 : vector<1x32xf32>
    %42 = vector.extract_strided_slice %32 {offsets = [0, 32], sizes = [1, 32], strides = [1, 1]} : vector<1x128xf32> to vector<1x32xf32>
    %43 = arith.mulf %42, %14 : vector<1x32xf32>
    %44 = vector.extract_strided_slice %32 {offsets = [0, 0], sizes = [1, 32], strides = [1, 1]} : vector<1x128xf32> to vector<1x32xf32>
    %45 = arith.mulf %44, %36 : vector<1x32xf32>
    %46 = arith.addf %43, %45 : vector<1x32xf32>
    %47 = vector.extract_strided_slice %27 {offsets = [0, 96], sizes = [1, 32], strides = [1, 1]} : vector<1x128xf32> to vector<1x32xf32>
    %48 = math.tanh %41 : vector<1x32xf32>
    %49 = arith.mulf %47, %48 : vector<1x32xf32>
    %50 = vector.extract_strided_slice %32 {offsets = [0, 96], sizes = [1, 32], strides = [1, 1]} : vector<1x128xf32> to vector<1x32xf32>
    %51 = math.tanh %46 : vector<1x32xf32>
    %52 = arith.mulf %50, %51 : vector<1x32xf32>
    %c0_i32 = arith.constant 0 : i32
    %53 = vector.broadcast %c0_i32 : i32 to vector<8x32xi32>
    %54 = arith.cmpi eq, %0, %53 : vector<8x32xi32>
    %55 = vector.shape_cast %49 : vector<1x32xf32> to vector<1x32xf32>
    %56 = vector.broadcast %55 : vector<1x32xf32> to vector<8x32xf32>
    %57 = arith.select %54, %56, %15 : vector<8x32xi1>, vector<8x32xf32>
    %c7_i32 = arith.constant 7 : i32
    %58 = vector.broadcast %c7_i32 : i32 to vector<8x32xi32>
    %59 = arith.cmpi eq, %0, %58 : vector<8x32xi32>
    %60 = vector.shape_cast %52 : vector<1x32xf32> to vector<1x32xf32>
    %61 = vector.broadcast %60 : vector<1x32xf32> to vector<8x32xf32>
    %62 = arith.select %59, %61, %16 : vector<8x32xi1>, vector<8x32xf32>
    %63 = vector.extract_strided_slice %9 {offsets = [1, 0], sizes = [1, 128], strides = [1, 1]} : vector<8x256xf32> to vector<1x128xf32>
    %cst_19 = arith.constant dense<0.000000e+00> : vector<1x128xf32>
    %64 = tpu.matmul %49, %1, %cst_19 {dimension_numbers = #tpu.dot_dimension_numbers<[1], [0], [0], [1], [0, 0, 1, 1], [], []>} : vector<1x32xf32>, vector<32x128xf32>, vector<1x128xf32> -> vector<1x128xf32>
    %65 = arith.addf %63, %64 : vector<1x128xf32>
    %66 = vector.extract_strided_slice %9 {offsets = [6, 128], sizes = [1, 128], strides = [1, 1]} : vector<8x256xf32> to vector<1x128xf32>
    %cst_20 = arith.constant dense<0.000000e+00> : vector<1x128xf32>
    %67 = tpu.matmul %52, %2, %cst_20 {dimension_numbers = #tpu.dot_dimension_numbers<[1], [0], [0], [1], [0, 0, 1, 1], [], []>} : vector<1x32xf32>, vector<32x128xf32>, vector<1x128xf32> -> vector<1x128xf32>
    %68 = arith.addf %66, %67 : vector<1x128xf32>
    %69 = arith.negf %65 : vector<1x128xf32>
    %70 = math.exp %69 : vector<1x128xf32>
    %cst_21 = arith.constant 1.000000e+00 : f32
    %71 = vector.broadcast %cst_21 : f32 to vector<1x128xf32>
    %72 = arith.addf %71, %70 : vector<1x128xf32>
    %73 = arith.divf %71, %72 : vector<1x128xf32>
    %74 = arith.negf %68 : vector<1x128xf32>
    %75 = math.exp %74 : vector<1x128xf32>
    %cst_22 = arith.constant 1.000000e+00 : f32
    %76 = vector.broadcast %cst_22 : f32 to vector<1x128xf32>
    %77 = arith.addf %76, %75 : vector<1x128xf32>
    %78 = arith.divf %76, %77 : vector<1x128xf32>
    %79 = vector.extract_strided_slice %65 {offsets = [0, 64], sizes = [1, 32], strides = [1, 1]} : vector<1x128xf32> to vector<1x32xf32>
    %80 = math.tanh %79 : vector<1x32xf32>
    %81 = vector.extract_strided_slice %68 {offsets = [0, 64], sizes = [1, 32], strides = [1, 1]} : vector<1x128xf32> to vector<1x32xf32>
    %82 = math.tanh %81 : vector<1x32xf32>
    %83 = vector.extract_strided_slice %73 {offsets = [0, 32], sizes = [1, 32], strides = [1, 1]} : vector<1x128xf32> to vector<1x32xf32>
    %84 = arith.mulf %83, %41 : vector<1x32xf32>
    %85 = vector.extract_strided_slice %73 {offsets = [0, 0], sizes = [1, 32], strides = [1, 1]} : vector<1x128xf32> to vector<1x32xf32>
    %86 = arith.mulf %85, %80 : vector<1x32xf32>
    %87 = arith.addf %84, %86 : vector<1x32xf32>
    %88 = vector.extract_strided_slice %78 {offsets = [0, 32], sizes = [1, 32], strides = [1, 1]} : vector<1x128xf32> to vector<1x32xf32>
    %89 = arith.mulf %88, %46 : vector<1x32xf32>
    %90 = vector.extract_strided_slice %78 {offsets = [0, 0], sizes = [1, 32], strides = [1, 1]} : vector<1x128xf32> to vector<1x32xf32>
    %91 = arith.mulf %90, %82 : vector<1x32xf32>
    %92 = arith.addf %89, %91 : vector<1x32xf32>
    %93 = vector.extract_strided_slice %73 {offsets = [0, 96], sizes = [1, 32], strides = [1, 1]} : vector<1x128xf32> to vector<1x32xf32>
    %94 = math.tanh %87 : vector<1x32xf32>
    %95 = arith.mulf %93, %94 : vector<1x32xf32>
    %96 = vector.extract_strided_slice %78 {offsets = [0, 96], sizes = [1, 32], strides = [1, 1]} : vector<1x128xf32> to vector<1x32xf32>
    %97 = math.tanh %92 : vector<1x32xf32>
    %98 = arith.mulf %96, %97 : vector<1x32xf32>
    %c1_i32 = arith.constant 1 : i32
    %99 = vector.broadcast %c1_i32 : i32 to vector<8x32xi32>
    %100 = arith.cmpi eq, %0, %99 : vector<8x32xi32>
    %101 = vector.shape_cast %95 : vector<1x32xf32> to vector<1x32xf32>
    %102 = vector.broadcast %101 : vector<1x32xf32> to vector<8x32xf32>
    %103 = arith.select %100, %102, %57 : vector<8x32xi1>, vector<8x32xf32>
    %c6_i32 = arith.constant 6 : i32
    %104 = vector.broadcast %c6_i32 : i32 to vector<8x32xi32>
    %105 = arith.cmpi eq, %0, %104 : vector<8x32xi32>
    %106 = vector.shape_cast %98 : vector<1x32xf32> to vector<1x32xf32>
    %107 = vector.broadcast %106 : vector<1x32xf32> to vector<8x32xf32>
    %108 = arith.select %105, %107, %62 : vector<8x32xi1>, vector<8x32xf32>
    %109 = vector.extract_strided_slice %9 {offsets = [2, 0], sizes = [1, 128], strides = [1, 1]} : vector<8x256xf32> to vector<1x128xf32>
    %cst_23 = arith.constant dense<0.000000e+00> : vector<1x128xf32>
    %110 = tpu.matmul %95, %1, %cst_23 {dimension_numbers = #tpu.dot_dimension_numbers<[1], [0], [0], [1], [0, 0, 1, 1], [], []>} : vector<1x32xf32>, vector<32x128xf32>, vector<1x128xf32> -> vector<1x128xf32>
    %111 = arith.addf %109, %110 : vector<1x128xf32>
    %112 = vector.extract_strided_slice %9 {offsets = [5, 128], sizes = [1, 128], strides = [1, 1]} : vector<8x256xf32> to vector<1x128xf32>
    %cst_24 = arith.constant dense<0.000000e+00> : vector<1x128xf32>
    %113 = tpu.matmul %98, %2, %cst_24 {dimension_numbers = #tpu.dot_dimension_numbers<[1], [0], [0], [1], [0, 0, 1, 1], [], []>} : vector<1x32xf32>, vector<32x128xf32>, vector<1x128xf32> -> vector<1x128xf32>
    %114 = arith.addf %112, %113 : vector<1x128xf32>
    %115 = arith.negf %111 : vector<1x128xf32>
    %116 = math.exp %115 : vector<1x128xf32>
    %cst_25 = arith.constant 1.000000e+00 : f32
    %117 = vector.broadcast %cst_25 : f32 to vector<1x128xf32>
    %118 = arith.addf %117, %116 : vector<1x128xf32>
    %119 = arith.divf %117, %118 : vector<1x128xf32>
    %120 = arith.negf %114 : vector<1x128xf32>
    %121 = math.exp %120 : vector<1x128xf32>
    %cst_26 = arith.constant 1.000000e+00 : f32
    %122 = vector.broadcast %cst_26 : f32 to vector<1x128xf32>
    %123 = arith.addf %122, %121 : vector<1x128xf32>
    %124 = arith.divf %122, %123 : vector<1x128xf32>
    %125 = vector.extract_strided_slice %111 {offsets = [0, 64], sizes = [1, 32], strides = [1, 1]} : vector<1x128xf32> to vector<1x32xf32>
    %126 = math.tanh %125 : vector<1x32xf32>
    %127 = vector.extract_strided_slice %114 {offsets = [0, 64], sizes = [1, 32], strides = [1, 1]} : vector<1x128xf32> to vector<1x32xf32>
    %128 = math.tanh %127 : vector<1x32xf32>
    %129 = vector.extract_strided_slice %119 {offsets = [0, 32], sizes = [1, 32], strides = [1, 1]} : vector<1x128xf32> to vector<1x32xf32>
    %130 = arith.mulf %129, %87 : vector<1x32xf32>
    %131 = vector.extract_strided_slice %119 {offsets = [0, 0], sizes = [1, 32], strides = [1, 1]} : vector<1x128xf32> to vector<1x32xf32>
    %132 = arith.mulf %131, %126 : vector<1x32xf32>
    %133 = arith.addf %130, %132 : vector<1x32xf32>
    %134 = vector.extract_strided_slice %124 {offsets = [0, 32], sizes = [1, 32], strides = [1, 1]} : vector<1x128xf32> to vector<1x32xf32>
    %135 = arith.mulf %134, %92 : vector<1x32xf32>
    %136 = vector.extract_strided_slice %124 {offsets = [0, 0], sizes = [1, 32], strides = [1, 1]} : vector<1x128xf32> to vector<1x32xf32>
    %137 = arith.mulf %136, %128 : vector<1x32xf32>
    %138 = arith.addf %135, %137 : vector<1x32xf32>
    %139 = vector.extract_strided_slice %119 {offsets = [0, 96], sizes = [1, 32], strides = [1, 1]} : vector<1x128xf32> to vector<1x32xf32>
    %140 = math.tanh %133 : vector<1x32xf32>
    %141 = arith.mulf %139, %140 : vector<1x32xf32>
    %142 = vector.extract_strided_slice %124 {offsets = [0, 96], sizes = [1, 32], strides = [1, 1]} : vector<1x128xf32> to vector<1x32xf32>
    %143 = math.tanh %138 : vector<1x32xf32>
    %144 = arith.mulf %142, %143 : vector<1x32xf32>
    %c2_i32 = arith.constant 2 : i32
    %145 = vector.broadcast %c2_i32 : i32 to vector<8x32xi32>
    %146 = arith.cmpi eq, %0, %145 : vector<8x32xi32>
    %147 = vector.shape_cast %141 : vector<1x32xf32> to vector<1x32xf32>
    %148 = vector.broadcast %147 : vector<1x32xf32> to vector<8x32xf32>
    %149 = arith.select %146, %148, %103 : vector<8x32xi1>, vector<8x32xf32>
    %c5_i32 = arith.constant 5 : i32
    %150 = vector.broadcast %c5_i32 : i32 to vector<8x32xi32>
    %151 = arith.cmpi eq, %0, %150 : vector<8x32xi32>
    %152 = vector.shape_cast %144 : vector<1x32xf32> to vector<1x32xf32>
    %153 = vector.broadcast %152 : vector<1x32xf32> to vector<8x32xf32>
    %154 = arith.select %151, %153, %108 : vector<8x32xi1>, vector<8x32xf32>
    %155 = vector.extract_strided_slice %9 {offsets = [3, 0], sizes = [1, 128], strides = [1, 1]} : vector<8x256xf32> to vector<1x128xf32>
    %cst_27 = arith.constant dense<0.000000e+00> : vector<1x128xf32>
    %156 = tpu.matmul %141, %1, %cst_27 {dimension_numbers = #tpu.dot_dimension_numbers<[1], [0], [0], [1], [0, 0, 1, 1], [], []>} : vector<1x32xf32>, vector<32x128xf32>, vector<1x128xf32> -> vector<1x128xf32>
    %157 = arith.addf %155, %156 : vector<1x128xf32>
    %158 = vector.extract_strided_slice %9 {offsets = [4, 128], sizes = [1, 128], strides = [1, 1]} : vector<8x256xf32> to vector<1x128xf32>
    %cst_28 = arith.constant dense<0.000000e+00> : vector<1x128xf32>
    %159 = tpu.matmul %144, %2, %cst_28 {dimension_numbers = #tpu.dot_dimension_numbers<[1], [0], [0], [1], [0, 0, 1, 1], [], []>} : vector<1x32xf32>, vector<32x128xf32>, vector<1x128xf32> -> vector<1x128xf32>
    %160 = arith.addf %158, %159 : vector<1x128xf32>
    %161 = arith.negf %157 : vector<1x128xf32>
    %162 = math.exp %161 : vector<1x128xf32>
    %cst_29 = arith.constant 1.000000e+00 : f32
    %163 = vector.broadcast %cst_29 : f32 to vector<1x128xf32>
    %164 = arith.addf %163, %162 : vector<1x128xf32>
    %165 = arith.divf %163, %164 : vector<1x128xf32>
    %166 = arith.negf %160 : vector<1x128xf32>
    %167 = math.exp %166 : vector<1x128xf32>
    %cst_30 = arith.constant 1.000000e+00 : f32
    %168 = vector.broadcast %cst_30 : f32 to vector<1x128xf32>
    %169 = arith.addf %168, %167 : vector<1x128xf32>
    %170 = arith.divf %168, %169 : vector<1x128xf32>
    %171 = vector.extract_strided_slice %157 {offsets = [0, 64], sizes = [1, 32], strides = [1, 1]} : vector<1x128xf32> to vector<1x32xf32>
    %172 = math.tanh %171 : vector<1x32xf32>
    %173 = vector.extract_strided_slice %160 {offsets = [0, 64], sizes = [1, 32], strides = [1, 1]} : vector<1x128xf32> to vector<1x32xf32>
    %174 = math.tanh %173 : vector<1x32xf32>
    %175 = vector.extract_strided_slice %165 {offsets = [0, 32], sizes = [1, 32], strides = [1, 1]} : vector<1x128xf32> to vector<1x32xf32>
    %176 = arith.mulf %175, %133 : vector<1x32xf32>
    %177 = vector.extract_strided_slice %165 {offsets = [0, 0], sizes = [1, 32], strides = [1, 1]} : vector<1x128xf32> to vector<1x32xf32>
    %178 = arith.mulf %177, %172 : vector<1x32xf32>
    %179 = arith.addf %176, %178 : vector<1x32xf32>
    %180 = vector.extract_strided_slice %170 {offsets = [0, 32], sizes = [1, 32], strides = [1, 1]} : vector<1x128xf32> to vector<1x32xf32>
    %181 = arith.mulf %180, %138 : vector<1x32xf32>
    %182 = vector.extract_strided_slice %170 {offsets = [0, 0], sizes = [1, 32], strides = [1, 1]} : vector<1x128xf32> to vector<1x32xf32>
    %183 = arith.mulf %182, %174 : vector<1x32xf32>
    %184 = arith.addf %181, %183 : vector<1x32xf32>
    %185 = vector.extract_strided_slice %165 {offsets = [0, 96], sizes = [1, 32], strides = [1, 1]} : vector<1x128xf32> to vector<1x32xf32>
    %186 = math.tanh %179 : vector<1x32xf32>
    %187 = arith.mulf %185, %186 : vector<1x32xf32>
    %188 = vector.extract_strided_slice %170 {offsets = [0, 96], sizes = [1, 32], strides = [1, 1]} : vector<1x128xf32> to vector<1x32xf32>
    %189 = math.tanh %184 : vector<1x32xf32>
    %190 = arith.mulf %188, %189 : vector<1x32xf32>
    %c3_i32 = arith.constant 3 : i32
    %191 = vector.broadcast %c3_i32 : i32 to vector<8x32xi32>
    %192 = arith.cmpi eq, %0, %191 : vector<8x32xi32>
    %193 = vector.shape_cast %187 : vector<1x32xf32> to vector<1x32xf32>
    %194 = vector.broadcast %193 : vector<1x32xf32> to vector<8x32xf32>
    %195 = arith.select %192, %194, %149 : vector<8x32xi1>, vector<8x32xf32>
    %c4_i32 = arith.constant 4 : i32
    %196 = vector.broadcast %c4_i32 : i32 to vector<8x32xi32>
    %197 = arith.cmpi eq, %0, %196 : vector<8x32xi32>
    %198 = vector.shape_cast %190 : vector<1x32xf32> to vector<1x32xf32>
    %199 = vector.broadcast %198 : vector<1x32xf32> to vector<8x32xf32>
    %200 = arith.select %197, %199, %154 : vector<8x32xi1>, vector<8x32xf32>
    %201 = vector.extract_strided_slice %9 {offsets = [4, 0], sizes = [1, 128], strides = [1, 1]} : vector<8x256xf32> to vector<1x128xf32>
    %cst_31 = arith.constant dense<0.000000e+00> : vector<1x128xf32>
    %202 = tpu.matmul %187, %1, %cst_31 {dimension_numbers = #tpu.dot_dimension_numbers<[1], [0], [0], [1], [0, 0, 1, 1], [], []>} : vector<1x32xf32>, vector<32x128xf32>, vector<1x128xf32> -> vector<1x128xf32>
    %203 = arith.addf %201, %202 : vector<1x128xf32>
    %204 = vector.extract_strided_slice %9 {offsets = [3, 128], sizes = [1, 128], strides = [1, 1]} : vector<8x256xf32> to vector<1x128xf32>
    %cst_32 = arith.constant dense<0.000000e+00> : vector<1x128xf32>
    %205 = tpu.matmul %190, %2, %cst_32 {dimension_numbers = #tpu.dot_dimension_numbers<[1], [0], [0], [1], [0, 0, 1, 1], [], []>} : vector<1x32xf32>, vector<32x128xf32>, vector<1x128xf32> -> vector<1x128xf32>
    %206 = arith.addf %204, %205 : vector<1x128xf32>
    %207 = arith.negf %203 : vector<1x128xf32>
    %208 = math.exp %207 : vector<1x128xf32>
    %cst_33 = arith.constant 1.000000e+00 : f32
    %209 = vector.broadcast %cst_33 : f32 to vector<1x128xf32>
    %210 = arith.addf %209, %208 : vector<1x128xf32>
    %211 = arith.divf %209, %210 : vector<1x128xf32>
    %212 = arith.negf %206 : vector<1x128xf32>
    %213 = math.exp %212 : vector<1x128xf32>
    %cst_34 = arith.constant 1.000000e+00 : f32
    %214 = vector.broadcast %cst_34 : f32 to vector<1x128xf32>
    %215 = arith.addf %214, %213 : vector<1x128xf32>
    %216 = arith.divf %214, %215 : vector<1x128xf32>
    %217 = vector.extract_strided_slice %203 {offsets = [0, 64], sizes = [1, 32], strides = [1, 1]} : vector<1x128xf32> to vector<1x32xf32>
    %218 = math.tanh %217 : vector<1x32xf32>
    %219 = vector.extract_strided_slice %206 {offsets = [0, 64], sizes = [1, 32], strides = [1, 1]} : vector<1x128xf32> to vector<1x32xf32>
    %220 = math.tanh %219 : vector<1x32xf32>
    %221 = vector.extract_strided_slice %211 {offsets = [0, 32], sizes = [1, 32], strides = [1, 1]} : vector<1x128xf32> to vector<1x32xf32>
    %222 = arith.mulf %221, %179 : vector<1x32xf32>
    %223 = vector.extract_strided_slice %211 {offsets = [0, 0], sizes = [1, 32], strides = [1, 1]} : vector<1x128xf32> to vector<1x32xf32>
    %224 = arith.mulf %223, %218 : vector<1x32xf32>
    %225 = arith.addf %222, %224 : vector<1x32xf32>
    %226 = vector.extract_strided_slice %216 {offsets = [0, 32], sizes = [1, 32], strides = [1, 1]} : vector<1x128xf32> to vector<1x32xf32>
    %227 = arith.mulf %226, %184 : vector<1x32xf32>
    %228 = vector.extract_strided_slice %216 {offsets = [0, 0], sizes = [1, 32], strides = [1, 1]} : vector<1x128xf32> to vector<1x32xf32>
    %229 = arith.mulf %228, %220 : vector<1x32xf32>
    %230 = arith.addf %227, %229 : vector<1x32xf32>
    %231 = vector.extract_strided_slice %211 {offsets = [0, 96], sizes = [1, 32], strides = [1, 1]} : vector<1x128xf32> to vector<1x32xf32>
    %232 = math.tanh %225 : vector<1x32xf32>
    %233 = arith.mulf %231, %232 : vector<1x32xf32>
    %234 = vector.extract_strided_slice %216 {offsets = [0, 96], sizes = [1, 32], strides = [1, 1]} : vector<1x128xf32> to vector<1x32xf32>
    %235 = math.tanh %230 : vector<1x32xf32>
    %236 = arith.mulf %234, %235 : vector<1x32xf32>
    %c4_i32_35 = arith.constant 4 : i32
    %237 = vector.broadcast %c4_i32_35 : i32 to vector<8x32xi32>
    %238 = arith.cmpi eq, %0, %237 : vector<8x32xi32>
    %239 = vector.shape_cast %233 : vector<1x32xf32> to vector<1x32xf32>
    %240 = vector.broadcast %239 : vector<1x32xf32> to vector<8x32xf32>
    %241 = arith.select %238, %240, %195 : vector<8x32xi1>, vector<8x32xf32>
    %c3_i32_36 = arith.constant 3 : i32
    %242 = vector.broadcast %c3_i32_36 : i32 to vector<8x32xi32>
    %243 = arith.cmpi eq, %0, %242 : vector<8x32xi32>
    %244 = vector.shape_cast %236 : vector<1x32xf32> to vector<1x32xf32>
    %245 = vector.broadcast %244 : vector<1x32xf32> to vector<8x32xf32>
    %246 = arith.select %243, %245, %200 : vector<8x32xi1>, vector<8x32xf32>
    %247 = vector.extract_strided_slice %9 {offsets = [5, 0], sizes = [1, 128], strides = [1, 1]} : vector<8x256xf32> to vector<1x128xf32>
    %cst_37 = arith.constant dense<0.000000e+00> : vector<1x128xf32>
    %248 = tpu.matmul %233, %1, %cst_37 {dimension_numbers = #tpu.dot_dimension_numbers<[1], [0], [0], [1], [0, 0, 1, 1], [], []>} : vector<1x32xf32>, vector<32x128xf32>, vector<1x128xf32> -> vector<1x128xf32>
    %249 = arith.addf %247, %248 : vector<1x128xf32>
    %250 = vector.extract_strided_slice %9 {offsets = [2, 128], sizes = [1, 128], strides = [1, 1]} : vector<8x256xf32> to vector<1x128xf32>
    %cst_38 = arith.constant dense<0.000000e+00> : vector<1x128xf32>
    %251 = tpu.matmul %236, %2, %cst_38 {dimension_numbers = #tpu.dot_dimension_numbers<[1], [0], [0], [1], [0, 0, 1, 1], [], []>} : vector<1x32xf32>, vector<32x128xf32>, vector<1x128xf32> -> vector<1x128xf32>
    %252 = arith.addf %250, %251 : vector<1x128xf32>
    %253 = arith.negf %249 : vector<1x128xf32>
    %254 = math.exp %253 : vector<1x128xf32>
    %cst_39 = arith.constant 1.000000e+00 : f32
    %255 = vector.broadcast %cst_39 : f32 to vector<1x128xf32>
    %256 = arith.addf %255, %254 : vector<1x128xf32>
    %257 = arith.divf %255, %256 : vector<1x128xf32>
    %258 = arith.negf %252 : vector<1x128xf32>
    %259 = math.exp %258 : vector<1x128xf32>
    %cst_40 = arith.constant 1.000000e+00 : f32
    %260 = vector.broadcast %cst_40 : f32 to vector<1x128xf32>
    %261 = arith.addf %260, %259 : vector<1x128xf32>
    %262 = arith.divf %260, %261 : vector<1x128xf32>
    %263 = vector.extract_strided_slice %249 {offsets = [0, 64], sizes = [1, 32], strides = [1, 1]} : vector<1x128xf32> to vector<1x32xf32>
    %264 = math.tanh %263 : vector<1x32xf32>
    %265 = vector.extract_strided_slice %252 {offsets = [0, 64], sizes = [1, 32], strides = [1, 1]} : vector<1x128xf32> to vector<1x32xf32>
    %266 = math.tanh %265 : vector<1x32xf32>
    %267 = vector.extract_strided_slice %257 {offsets = [0, 32], sizes = [1, 32], strides = [1, 1]} : vector<1x128xf32> to vector<1x32xf32>
    %268 = arith.mulf %267, %225 : vector<1x32xf32>
    %269 = vector.extract_strided_slice %257 {offsets = [0, 0], sizes = [1, 32], strides = [1, 1]} : vector<1x128xf32> to vector<1x32xf32>
    %270 = arith.mulf %269, %264 : vector<1x32xf32>
    %271 = arith.addf %268, %270 : vector<1x32xf32>
    %272 = vector.extract_strided_slice %262 {offsets = [0, 32], sizes = [1, 32], strides = [1, 1]} : vector<1x128xf32> to vector<1x32xf32>
    %273 = arith.mulf %272, %230 : vector<1x32xf32>
    %274 = vector.extract_strided_slice %262 {offsets = [0, 0], sizes = [1, 32], strides = [1, 1]} : vector<1x128xf32> to vector<1x32xf32>
    %275 = arith.mulf %274, %266 : vector<1x32xf32>
    %276 = arith.addf %273, %275 : vector<1x32xf32>
    %277 = vector.extract_strided_slice %257 {offsets = [0, 96], sizes = [1, 32], strides = [1, 1]} : vector<1x128xf32> to vector<1x32xf32>
    %278 = math.tanh %271 : vector<1x32xf32>
    %279 = arith.mulf %277, %278 : vector<1x32xf32>
    %280 = vector.extract_strided_slice %262 {offsets = [0, 96], sizes = [1, 32], strides = [1, 1]} : vector<1x128xf32> to vector<1x32xf32>
    %281 = math.tanh %276 : vector<1x32xf32>
    %282 = arith.mulf %280, %281 : vector<1x32xf32>
    %c5_i32_41 = arith.constant 5 : i32
    %283 = vector.broadcast %c5_i32_41 : i32 to vector<8x32xi32>
    %284 = arith.cmpi eq, %0, %283 : vector<8x32xi32>
    %285 = vector.shape_cast %279 : vector<1x32xf32> to vector<1x32xf32>
    %286 = vector.broadcast %285 : vector<1x32xf32> to vector<8x32xf32>
    %287 = arith.select %284, %286, %241 : vector<8x32xi1>, vector<8x32xf32>
    %c2_i32_42 = arith.constant 2 : i32
    %288 = vector.broadcast %c2_i32_42 : i32 to vector<8x32xi32>
    %289 = arith.cmpi eq, %0, %288 : vector<8x32xi32>
    %290 = vector.shape_cast %282 : vector<1x32xf32> to vector<1x32xf32>
    %291 = vector.broadcast %290 : vector<1x32xf32> to vector<8x32xf32>
    %292 = arith.select %289, %291, %246 : vector<8x32xi1>, vector<8x32xf32>
    %293 = vector.extract_strided_slice %9 {offsets = [6, 0], sizes = [1, 128], strides = [1, 1]} : vector<8x256xf32> to vector<1x128xf32>
    %cst_43 = arith.constant dense<0.000000e+00> : vector<1x128xf32>
    %294 = tpu.matmul %279, %1, %cst_43 {dimension_numbers = #tpu.dot_dimension_numbers<[1], [0], [0], [1], [0, 0, 1, 1], [], []>} : vector<1x32xf32>, vector<32x128xf32>, vector<1x128xf32> -> vector<1x128xf32>
    %295 = arith.addf %293, %294 : vector<1x128xf32>
    %296 = vector.extract_strided_slice %9 {offsets = [1, 128], sizes = [1, 128], strides = [1, 1]} : vector<8x256xf32> to vector<1x128xf32>
    %cst_44 = arith.constant dense<0.000000e+00> : vector<1x128xf32>
    %297 = tpu.matmul %282, %2, %cst_44 {dimension_numbers = #tpu.dot_dimension_numbers<[1], [0], [0], [1], [0, 0, 1, 1], [], []>} : vector<1x32xf32>, vector<32x128xf32>, vector<1x128xf32> -> vector<1x128xf32>
    %298 = arith.addf %296, %297 : vector<1x128xf32>
    %299 = arith.negf %295 : vector<1x128xf32>
    %300 = math.exp %299 : vector<1x128xf32>
    %cst_45 = arith.constant 1.000000e+00 : f32
    %301 = vector.broadcast %cst_45 : f32 to vector<1x128xf32>
    %302 = arith.addf %301, %300 : vector<1x128xf32>
    %303 = arith.divf %301, %302 : vector<1x128xf32>
    %304 = arith.negf %298 : vector<1x128xf32>
    %305 = math.exp %304 : vector<1x128xf32>
    %cst_46 = arith.constant 1.000000e+00 : f32
    %306 = vector.broadcast %cst_46 : f32 to vector<1x128xf32>
    %307 = arith.addf %306, %305 : vector<1x128xf32>
    %308 = arith.divf %306, %307 : vector<1x128xf32>
    %309 = vector.extract_strided_slice %295 {offsets = [0, 64], sizes = [1, 32], strides = [1, 1]} : vector<1x128xf32> to vector<1x32xf32>
    %310 = math.tanh %309 : vector<1x32xf32>
    %311 = vector.extract_strided_slice %298 {offsets = [0, 64], sizes = [1, 32], strides = [1, 1]} : vector<1x128xf32> to vector<1x32xf32>
    %312 = math.tanh %311 : vector<1x32xf32>
    %313 = vector.extract_strided_slice %303 {offsets = [0, 32], sizes = [1, 32], strides = [1, 1]} : vector<1x128xf32> to vector<1x32xf32>
    %314 = arith.mulf %313, %271 : vector<1x32xf32>
    %315 = vector.extract_strided_slice %303 {offsets = [0, 0], sizes = [1, 32], strides = [1, 1]} : vector<1x128xf32> to vector<1x32xf32>
    %316 = arith.mulf %315, %310 : vector<1x32xf32>
    %317 = arith.addf %314, %316 : vector<1x32xf32>
    %318 = vector.extract_strided_slice %308 {offsets = [0, 32], sizes = [1, 32], strides = [1, 1]} : vector<1x128xf32> to vector<1x32xf32>
    %319 = arith.mulf %318, %276 : vector<1x32xf32>
    %320 = vector.extract_strided_slice %308 {offsets = [0, 0], sizes = [1, 32], strides = [1, 1]} : vector<1x128xf32> to vector<1x32xf32>
    %321 = arith.mulf %320, %312 : vector<1x32xf32>
    %322 = arith.addf %319, %321 : vector<1x32xf32>
    %323 = vector.extract_strided_slice %303 {offsets = [0, 96], sizes = [1, 32], strides = [1, 1]} : vector<1x128xf32> to vector<1x32xf32>
    %324 = math.tanh %317 : vector<1x32xf32>
    %325 = arith.mulf %323, %324 : vector<1x32xf32>
    %326 = vector.extract_strided_slice %308 {offsets = [0, 96], sizes = [1, 32], strides = [1, 1]} : vector<1x128xf32> to vector<1x32xf32>
    %327 = math.tanh %322 : vector<1x32xf32>
    %328 = arith.mulf %326, %327 : vector<1x32xf32>
    %c6_i32_47 = arith.constant 6 : i32
    %329 = vector.broadcast %c6_i32_47 : i32 to vector<8x32xi32>
    %330 = arith.cmpi eq, %0, %329 : vector<8x32xi32>
    %331 = vector.shape_cast %325 : vector<1x32xf32> to vector<1x32xf32>
    %332 = vector.broadcast %331 : vector<1x32xf32> to vector<8x32xf32>
    %333 = arith.select %330, %332, %287 : vector<8x32xi1>, vector<8x32xf32>
    %c1_i32_48 = arith.constant 1 : i32
    %334 = vector.broadcast %c1_i32_48 : i32 to vector<8x32xi32>
    %335 = arith.cmpi eq, %0, %334 : vector<8x32xi32>
    %336 = vector.shape_cast %328 : vector<1x32xf32> to vector<1x32xf32>
    %337 = vector.broadcast %336 : vector<1x32xf32> to vector<8x32xf32>
    %338 = arith.select %335, %337, %292 : vector<8x32xi1>, vector<8x32xf32>
    %339 = vector.extract_strided_slice %9 {offsets = [7, 0], sizes = [1, 128], strides = [1, 1]} : vector<8x256xf32> to vector<1x128xf32>
    %cst_49 = arith.constant dense<0.000000e+00> : vector<1x128xf32>
    %340 = tpu.matmul %325, %1, %cst_49 {dimension_numbers = #tpu.dot_dimension_numbers<[1], [0], [0], [1], [0, 0, 1, 1], [], []>} : vector<1x32xf32>, vector<32x128xf32>, vector<1x128xf32> -> vector<1x128xf32>
    %341 = arith.addf %339, %340 : vector<1x128xf32>
    %342 = vector.extract_strided_slice %9 {offsets = [0, 128], sizes = [1, 128], strides = [1, 1]} : vector<8x256xf32> to vector<1x128xf32>
    %cst_50 = arith.constant dense<0.000000e+00> : vector<1x128xf32>
    %343 = tpu.matmul %328, %2, %cst_50 {dimension_numbers = #tpu.dot_dimension_numbers<[1], [0], [0], [1], [0, 0, 1, 1], [], []>} : vector<1x32xf32>, vector<32x128xf32>, vector<1x128xf32> -> vector<1x128xf32>
    %344 = arith.addf %342, %343 : vector<1x128xf32>
    %345 = arith.negf %341 : vector<1x128xf32>
    %346 = math.exp %345 : vector<1x128xf32>
    %cst_51 = arith.constant 1.000000e+00 : f32
    %347 = vector.broadcast %cst_51 : f32 to vector<1x128xf32>
    %348 = arith.addf %347, %346 : vector<1x128xf32>
    %349 = arith.divf %347, %348 : vector<1x128xf32>
    %350 = arith.negf %344 : vector<1x128xf32>
    %351 = math.exp %350 : vector<1x128xf32>
    %cst_52 = arith.constant 1.000000e+00 : f32
    %352 = vector.broadcast %cst_52 : f32 to vector<1x128xf32>
    %353 = arith.addf %352, %351 : vector<1x128xf32>
    %354 = arith.divf %352, %353 : vector<1x128xf32>
    %355 = vector.extract_strided_slice %341 {offsets = [0, 64], sizes = [1, 32], strides = [1, 1]} : vector<1x128xf32> to vector<1x32xf32>
    %356 = math.tanh %355 : vector<1x32xf32>
    %357 = vector.extract_strided_slice %344 {offsets = [0, 64], sizes = [1, 32], strides = [1, 1]} : vector<1x128xf32> to vector<1x32xf32>
    %358 = math.tanh %357 : vector<1x32xf32>
    %359 = vector.extract_strided_slice %349 {offsets = [0, 32], sizes = [1, 32], strides = [1, 1]} : vector<1x128xf32> to vector<1x32xf32>
    %360 = arith.mulf %359, %317 : vector<1x32xf32>
    %361 = vector.extract_strided_slice %349 {offsets = [0, 0], sizes = [1, 32], strides = [1, 1]} : vector<1x128xf32> to vector<1x32xf32>
    %362 = arith.mulf %361, %356 : vector<1x32xf32>
    %363 = arith.addf %360, %362 : vector<1x32xf32>
    %364 = vector.extract_strided_slice %354 {offsets = [0, 32], sizes = [1, 32], strides = [1, 1]} : vector<1x128xf32> to vector<1x32xf32>
    %365 = arith.mulf %364, %322 : vector<1x32xf32>
    %366 = vector.extract_strided_slice %354 {offsets = [0, 0], sizes = [1, 32], strides = [1, 1]} : vector<1x128xf32> to vector<1x32xf32>
    %367 = arith.mulf %366, %358 : vector<1x32xf32>
    %368 = arith.addf %365, %367 : vector<1x32xf32>
    %369 = vector.extract_strided_slice %349 {offsets = [0, 96], sizes = [1, 32], strides = [1, 1]} : vector<1x128xf32> to vector<1x32xf32>
    %370 = math.tanh %363 : vector<1x32xf32>
    %371 = arith.mulf %369, %370 : vector<1x32xf32>
    %372 = vector.extract_strided_slice %354 {offsets = [0, 96], sizes = [1, 32], strides = [1, 1]} : vector<1x128xf32> to vector<1x32xf32>
    %373 = math.tanh %368 : vector<1x32xf32>
    %374 = arith.mulf %372, %373 : vector<1x32xf32>
    %c7_i32_53 = arith.constant 7 : i32
    %375 = vector.broadcast %c7_i32_53 : i32 to vector<8x32xi32>
    %376 = arith.cmpi eq, %0, %375 : vector<8x32xi32>
    %377 = vector.shape_cast %371 : vector<1x32xf32> to vector<1x32xf32>
    %378 = vector.broadcast %377 : vector<1x32xf32> to vector<8x32xf32>
    %379 = arith.select %376, %378, %333 : vector<8x32xi1>, vector<8x32xf32>
    %c0_i32_54 = arith.constant 0 : i32
    %380 = vector.broadcast %c0_i32_54 : i32 to vector<8x32xi32>
    %381 = arith.cmpi eq, %0, %380 : vector<8x32xi32>
    %382 = vector.shape_cast %374 : vector<1x32xf32> to vector<1x32xf32>
    %383 = vector.broadcast %382 : vector<1x32xf32> to vector<8x32xf32>
    %384 = arith.select %381, %383, %338 : vector<8x32xi1>, vector<8x32xf32>
    %cst_55 = arith.constant dense<0.000000e+00> : vector<1x128xf32>
    %385 = tpu.matmul %371, %1, %cst_55 {dimension_numbers = #tpu.dot_dimension_numbers<[1], [0], [0], [1], [0, 0, 1, 1], [], []>} : vector<1x32xf32>, vector<32x128xf32>, vector<1x128xf32> -> vector<1x128xf32>
    %cst_56 = arith.constant dense<0.000000e+00> : vector<1x128xf32>
    %386 = tpu.matmul %374, %2, %cst_56 {dimension_numbers = #tpu.dot_dimension_numbers<[1], [0], [0], [1], [0, 0, 1, 1], [], []>} : vector<1x32xf32>, vector<32x128xf32>, vector<1x128xf32> -> vector<1x128xf32>
    %387 = vector.extract_strided_slice %10 {offsets = [0, 0], sizes = [4, 128], strides = [1, 1]} : vector<4x256xf32> to vector<4x128xf32>
    %388 = vector.broadcast %385 : vector<1x128xf32> to vector<4x128xf32>
    %389 = arith.addf %387, %388 : vector<4x128xf32>
    %390 = vector.extract_strided_slice %10 {offsets = [0, 128], sizes = [4, 128], strides = [1, 1]} : vector<4x256xf32> to vector<4x128xf32>
    %391 = vector.broadcast %386 : vector<1x128xf32> to vector<4x128xf32>
    %392 = arith.addf %390, %391 : vector<4x128xf32>
    %393 = arith.negf %389 : vector<4x128xf32>
    %394 = math.exp %393 : vector<4x128xf32>
    %cst_57 = arith.constant 1.000000e+00 : f32
    %395 = vector.broadcast %cst_57 : f32 to vector<4x128xf32>
    %396 = arith.addf %395, %394 : vector<4x128xf32>
    %397 = arith.divf %395, %396 : vector<4x128xf32>
    %398 = arith.negf %392 : vector<4x128xf32>
    %399 = math.exp %398 : vector<4x128xf32>
    %cst_58 = arith.constant 1.000000e+00 : f32
    %400 = vector.broadcast %cst_58 : f32 to vector<4x128xf32>
    %401 = arith.addf %400, %399 : vector<4x128xf32>
    %402 = arith.divf %400, %401 : vector<4x128xf32>
    %403 = vector.extract_strided_slice %389 {offsets = [0, 64], sizes = [4, 32], strides = [1, 1]} : vector<4x128xf32> to vector<4x32xf32>
    %404 = math.tanh %403 : vector<4x32xf32>
    %405 = vector.extract_strided_slice %392 {offsets = [0, 64], sizes = [4, 32], strides = [1, 1]} : vector<4x128xf32> to vector<4x32xf32>
    %406 = math.tanh %405 : vector<4x32xf32>
    %407 = vector.extract_strided_slice %397 {offsets = [0, 32], sizes = [4, 32], strides = [1, 1]} : vector<4x128xf32> to vector<4x32xf32>
    %408 = vector.broadcast %363 : vector<1x32xf32> to vector<4x32xf32>
    %409 = arith.mulf %407, %408 : vector<4x32xf32>
    %410 = vector.extract_strided_slice %397 {offsets = [0, 0], sizes = [4, 32], strides = [1, 1]} : vector<4x128xf32> to vector<4x32xf32>
    %411 = arith.mulf %410, %404 : vector<4x32xf32>
    %412 = arith.addf %409, %411 : vector<4x32xf32>
    %413 = vector.extract_strided_slice %402 {offsets = [0, 32], sizes = [4, 32], strides = [1, 1]} : vector<4x128xf32> to vector<4x32xf32>
    %414 = vector.broadcast %368 : vector<1x32xf32> to vector<4x32xf32>
    %415 = arith.mulf %413, %414 : vector<4x32xf32>
    %416 = vector.extract_strided_slice %402 {offsets = [0, 0], sizes = [4, 32], strides = [1, 1]} : vector<4x128xf32> to vector<4x32xf32>
    %417 = arith.mulf %416, %406 : vector<4x32xf32>
    %418 = arith.addf %415, %417 : vector<4x32xf32>
    %419 = vector.extract_strided_slice %397 {offsets = [0, 96], sizes = [4, 32], strides = [1, 1]} : vector<4x128xf32> to vector<4x32xf32>
    %420 = math.tanh %412 : vector<4x32xf32>
    %421 = arith.mulf %419, %420 : vector<4x32xf32>
    %422 = vector.extract_strided_slice %402 {offsets = [0, 96], sizes = [4, 32], strides = [1, 1]} : vector<4x128xf32> to vector<4x32xf32>
    %423 = math.tanh %418 : vector<4x32xf32>
    %424 = arith.mulf %422, %423 : vector<4x32xf32>
    %c0_59 = arith.constant 0 : index
    %c0_60 = arith.constant 0 : index
    %425 = vector.load %arg5[%c0_59, %c0_60] : memref<8x64xf32, #tpu.memory_space<vmem>>, vector<8x32xf32>
    tpu.vector_store %arg5[%c0_59, %c0_60], %379 {strides = array<i32>} : memref<8x64xf32, #tpu.memory_space<vmem>>, vector<8x32xf32>,
    %c0_61 = arith.constant 0 : index
    %c32 = arith.constant 32 : index
    %426 = vector.load %arg5[%c0_61, %c32] : memref<8x64xf32, #tpu.memory_space<vmem>>, vector<8x32xf32>
    tpu.vector_store %arg5[%c0_61, %c32], %384 {strides = array<i32>} : memref<8x64xf32, #tpu.memory_space<vmem>>, vector<8x32xf32>,
    %c0_62 = arith.constant 0 : index
    %c0_63 = arith.constant 0 : index
    %427 = vector.load %arg6[%c0_62, %c0_63] : memref<4x64xf32, #tpu.memory_space<vmem>>, vector<4x32xf32>
    tpu.vector_store %arg6[%c0_62, %c0_63], %421 {strides = array<i32>} : memref<4x64xf32, #tpu.memory_space<vmem>>, vector<4x32xf32>,
    %c0_64 = arith.constant 0 : index
    %c32_65 = arith.constant 32 : index
    %428 = vector.load %arg6[%c0_64, %c32_65] : memref<4x64xf32, #tpu.memory_space<vmem>>, vector<4x32xf32>
    tpu.vector_store %arg6[%c0_64, %c32_65], %424 {strides = array<i32>} : memref<4x64xf32, #tpu.memory_space<vmem>>, vector<4x32xf32>,
    return
  }
}

</mosaic_0001>

<bundles_post_ra>
// kernel: bidirectional_lstm_forward.1
= control target key start
LH: loop header
LB: loop body
LE: loop exit
PB: predicated region body
PF: predicated region fallthrough
CT: control target
= control target key end

     0   :  { %12 = vsyncpa [#allocation3], 0  ;;  %v2842_v5 = vmov 0.0|0.0   ;;  %vm2843_vm0 = vmmov 0   ;;  %v2844_v8 = vmov 0.0   ;;  %s3424_s0 = inlined_call_operand.vmem [shape: f32[12,64], index: 0, kind: input, shape index: {}]   ;;  %s3425_s1 = inlined_call_operand.vmem [shape: f32[64,256], index: 1, kind: input, shape index: {}]   ;;  %s3426_s2 = inlined_call_operand.vmem [shape: f32[32,128], index: 2, kind: input, shape index: {}]   ;;  %s3427_s3 = inlined_call_operand.vmem [shape: f32[32,128], index: 3, kind: input, shape index: {}]   ;;  %s3428_s4 = inlined_call_operand.vmem [shape: f32[1,256], index: 4, kind: input, shape index: {}]   ;;  %s3429_s5 = inlined_call_operand.hbm [shape: f32[8,64], index: 5, kind: output, shape index: {0}]   ;;  %s3430_s6 = inlined_call_operand.hbm [shape: f32[4,64], index: 6, kind: output, shape index: {1}]  }
   0x1   :  { %v38_v0 = vld [vmem:[%s3425_s1 + $0x8] sm:$0xff]  ;;  %v40_v1 = vld [vmem:[%s3425_s1 + $0x18] sm:$0xff]  ;;  %v37_v2 = vld [vmem:[%s3425_s1] sm:$0xff]  ;;  %2535 = vmatprep.subr.bf16.mxu1 %v2842_v5  ;;  %2329 = vmatprep.mubr.msk.f32.mxu1 %vm2843_vm0, %v2844_v8 }
   0x2   :  { %v2519_v3 = vpack.c.bf16 %v40_v1, %v38_v0  ;;  %v39_v4 = vld [vmem:[%s3425_s1 + $0x10] sm:$0xff]  ;;  %v26_v6 = vld [vmem:[%s3426_s2] sm:$0xff]  ;;  %v27_v7 = vld [vmem:[%s3426_s2 + $0x8] sm:$0xff]  ;;  %135 = vmatprep.mubr.f32.mxu0 %v2844_v8 }
   0x3   :  { %v2521_v9 = vpack.c.bf16 %v39_v4, %v37_v2  ;;  %v2905_v10 = vpack.c.bf16 %v27_v7, %v26_v6  ;;  %v42_v11 = vld [vmem:[%s3425_s1 + $0x28] sm:$0xff]  ;;  %v44_v12 = vld [vmem:[%s3425_s1 + $0x38] sm:$0xff]  ;;  %v41_v13 = vld [vmem:[%s3425_s1 + $0x20] sm:$0xff] }
   0x4   :  { %2520 = vmatprep.subr.bf16.mxu0 %v2519_v3  ;;  %v2523_v14 = vpack.c.bf16 %v44_v12, %v42_v11  ;;  %v43_v15 = vld [vmem:[%s3425_s1 + $0x30] sm:$0xff]  ;;  %v29_v17 = vld [vmem:[%s3426_s2 + $0x18] sm:$0xff]  ;;  %v46_v20 = vld [vmem:[%s3425_s1 + $0x48] sm:$0xff] }
   0x5   :  { %v28_v16 = vld [vmem:[%s3426_s2 + $0x10] sm:$0xff]  ;;  %2522 = vmatpush1.bf16.msra.mxu0 %v2521_v9  ;;  %2537 = vmatpush3.bf16.msra.mxu1 %v2905_v10  ;;  %v2525_v18 = vpack.c.bf16 %v43_v15, %v41_v13  ;;  %v48_v21 = vld [vmem:[%s3425_s1 + $0x58] sm:$0xff]  ;;  %v45_v22 = vld [vmem:[%s3425_s1 + $0x40] sm:$0xff] }
   0x6   :  { %v2927_v19 = vpack.c.bf16 %v29_v17, %v28_v16  ;;  %2524 = vmatprep.subr.bf16.mxu0 %v2523_v14  ;;  %2538 = vmatprep.subr.bf16.mxu1 %v2842_v5  ;;  %v2527_v23 = vpack.c.bf16 %v48_v21, %v46_v20  ;;  %v47_v24 = vld [vmem:[%s3425_s1 + $0x50] sm:$0xff]  ;;  %v30_v25 = vld [vmem:[%s3427_s3] sm:$0xff]  ;;  %v31_v26 = vld [vmem:[%s3427_s3 + $0x8] sm:$0xff] }
   0x7   :  { %v50_v27 = vld [vmem:[%s3425_s1 + $0x68] sm:$0xff]  ;;  %v52_v28 = vld [vmem:[%s3425_s1 + $0x78] sm:$0xff]  ;;  %v2529_v29 = vpack.c.bf16 %v47_v24, %v45_v22  ;;  %v2955_v30 = vpack.c.bf16 %v31_v26, %v30_v25  ;;  %v49_v31 = vld [vmem:[%s3425_s1 + $0x60] sm:$0xff] }
   0x9   :  { %2526 = vmatpush1.bf16.msra.mxu0 %v2525_v18  ;;  %2540 = vmatpush3.bf16.msra.mxu1 %v2927_v19 }
   0xa   :  { %13 = vsyncpa [#allocation5], 0  ;;  %2528 = vmatprep.subr.bf16.mxu0 %v2527_v23  ;;  %2541 = vmatprep.subr.bf16.mxu1 %v2842_v5  ;;  %v2531_v32 = vpack.c.bf16 %v52_v28, %v50_v27  ;;  %v51_v33 = vld [vmem:[%s3425_s1 + $0x70] sm:$0xff]  ;;  %v33_v35 = vld [vmem:[%s3427_s3 + $0x18] sm:$0xff]  ;;  %vm64_vm1 = vcmask 523264   ;;  %v24_v39 = vlaneseq  ;;  %s2846_s22 = smov 32  }
   0xb   :  { %v32_v34 = vld [vmem:[%s3427_s3 + $0x10] sm:$0xff]  ;;  %v2533_v36 = vpack.c.bf16 %v51_v33, %v49_v31  ;;  %v35_v38 = vld [vmem:[%s3424_s0] sm:$0xff]  ;;  %v36_v16 = vld [vmem:[%s3424_s0 + $0x8] sm:$0xf]  ;;  %vm148_vm2 = vcmask 261120   ;;  %s2847_s0 = smov [#allocation2]  }
   0xc   :  { %2330 = vmatmul.mubr.f32.vlgmr.msra.gmra.mrb[0].mxu1 %v2844_v8  ;;  %v2972_v37 = vpack.c.bf16 %v33_v35, %v32_v34  ;;  %v2996_v40 = vshrl.u32 %v24_v39, 7  ;;  %v34_v44 = vld [vmem:[%s3428_s4] sm:$0x3]  ;;  %s2845_s4 = smov 64   ;;  %s2173_s25 = sshll.u32 %s2847_s0, 4  ;;  %vm2153_vm11 = vcmask 523520   ;;  %s2174_s25 = int_to_ptr.vmem [resolvable:$true] %s2173_s25 }
   0xd   :  { %2530 = vmatpush1.bf16.msra.mxu0 %v2529_v29  ;;  %2543 = vmatpush3.bf16.msra.mxu1 %v2955_v30  ;;  %s2794_s26 = scalar_lea.vmem %s2174_s25, 128  ;;  %p2799_p1 = scmp.lt.s32.totalorder %s2174_s25, %s2174_s25 }
   0xe   :  { %2532 = vmatprep.subr.bf16.mxu0 %v2531_v32  ;;  %2544 = vmatprep.subr.bf16.mxu1 %v2842_v5  ;;  %v2999_v43 = vsub.s32 0, %v2996_v40  ;;  %v3005_v45 = vsub.s32 1, %v2996_v40  ;;  %vm345_vm3 = vcmp.eq.s32.totalorder %v2996_v40, 0  ;;  %vm570_vm4 = vcmp.eq.s32.totalorder %v2996_v40, 1  ;;  %p2795_p0 = scmp.ne.s32.totalorder %s2174_s25, %s2794_s26  ;;  %p2800_p2 = scmp.lt.s32.totalorder %s2794_s26, %s2794_s26 }
   0xf   :  { %2340 = vmatprep.mubr.msk.f32.mxu1 %vm2843_vm0, %v2844_v8  ;;  %vm351_vm5 = vcmp.eq.s32.totalorder %v2996_v40, 7  ;;  %vm576_vm6 = vcmp.eq.s32.totalorder %v2996_v40, 6  ;;  %vm796_vm7 = vcmp.eq.s32.totalorder %v2996_v40, 2  ;;  %vm802_vm8 = vcmp.eq.s32.totalorder %v2996_v40, 5 }
  0x10   :  { %v3008_v46 = vrot.slane %v34_v44, %v2999_v43  ;;  %v3011_v47 = vrot.slane %v34_v44, %v3005_v45  ;;  %vm1022_vm9 = vcmp.eq.s32.totalorder %v2996_v40, 3  ;;  %vm1028_vm10 = vcmp.eq.s32.totalorder %v2996_v40, 4  ;;  %p2801_p3 = por %p2800_p2, %p2799_p1 }
  0x11   :  { %2534 = vmatpush1.bf16.msra.mxu0 %v2533_v36  ;;  %2546 = vmatpush3.bf16.msra.mxu1 %v2972_v37 }
  0x12   :  { %2547 = vmatprep.subr.bf16.mxu0 %v2842_v5  ;;  %2553 = vmatprep.subr.bf16.mxu1 %v2842_v5  ;;  %p2802_p4 = pnand %p2801_p3, %p2795_p0 }
  0x14   :  { %2195 = vmatmul.mubr.msk.f32.vlgmr.msra.gmra.mrb[0].mxu0 %vm64_vm1, %v35_v38  ;;  %2341 = vmatmul.mubr.f32.vlgmr.msra.gmra.mrb[2].mxu1 %v2844_v8 }
  0x15   :  { %2549 = vmatpush3.bf16.msra.mxu0 %v2905_v10  ;;  %141 = vmatprep.mubr.f32.mxu0 %v2844_v8 }
  0x16   :  { %2550 = vmatprep.subr.bf16.mxu0 %v2842_v5  ;;  %2555 = vmatpush3.bf16.msra.mxu1 %v2955_v30 }
  0x17   :  { %2556 = vmatprep.subr.bf16.mxu1 %v2842_v5  ;;  %2362 = vmatprep.mubr.msk.f32.mxu1 %vm2843_vm0, %v2844_v8 }
  0x18   :  { %2196 = vmatmul.mubr.msk.f32.gmra.mrb[2].mxu0 %vm64_vm1, %v36_v16 }
  0x19   :  { %2552 = vmatpush3.bf16.msra.mxu0 %v2927_v19  ;;  %2351 = vmatprep.mubr.msk.f32.mxu0 %vm2843_vm0, %v2844_v8 }
  0x1a   :  { %2558 = vmatpush3.bf16.msra.mxu1 %v2972_v37  ;;  %2559 = vmatprep.subr.bf16.mxu0 %v2842_v5 }
  0x1b   :  { %2565 = vmatprep.subr.bf16.mxu1 %v2842_v5 }
  0xdf   :  { %v218_v41 = vpop.f32.mrb[0].mxu1 }
  0xe0   :  { %v2331_v42 = vpop.f32.mrb[1].mxu1 }
  0xe7   :  { %v137_v48 = vpop.f32.mrb[0].mxu0  ;;  %v289_v49 = vpop.f32.mrb[2].mxu1 }
  0xe8   :  { %v3014_v50 = vadd.f32 %v137_v48, %v3008_v46  ;;  %v139_v51 = vpop.f32.mrb[1].mxu0  ;;  %v294_v52 = vrot.slane %v289_v49, 1  ;;  %v2342_v53 = vpop.f32.mrb[3].mxu1 }
  0xe9   :  { %v3017_v54 = vadd.f32 %v139_v51, %v3011_v47 }
  0xea   :  { %v222_v55 = vadd.f32 %v218_v41, %v3014_v50 }
  0xeb   :  { %v296_v56 = vadd.f32 %v294_v52, %v3017_v54  ;;  %v3047_v25 = vpop.f32.mrb[2].mxu0 }
  0xec   :  { %2650 = vtanh.f32 %v222_v55  ;;  %v2197_v59 = vmul.f32 -1.442695, %v222_v55  ;;  %v3049_v26 = vpop.f32.mrb[3].mxu0 }
  0xed   :  { %2652 = vtanh.f32 %v296_v56  ;;  %v2198_v60 = vmul.f32 -1.442695, %v296_v56 }
  0xee   :  { %2654 = vpow2.f32 %v2197_v59 }
  0xef   :  { %2656 = vpow2.f32 %v2198_v60 }
  0xf6   :  { %v2651_v57 = vpop.eup %2650 }
  0xf7   :  { %313 = vrot.lane.b32.xlu0 %v2651_v57, %s2845_s4  ;;  %v2653_v58 = vpop.eup %2652 }
  0xf8   :  { %v2655_v61 = vpop.eup %2654 }
  0xf9   :  { %v300_v62 = vadd.f32 1.0, %v2655_v61  ;;  %v2657_v63 = vpop.eup %2656 }
  0xfa   :  { %v306_v0 = vadd.f32 1.0, %v2657_v63 }
  0xfb   :  { %324 = vrot.lane.b32.xlu0 %v2653_v58, %s2845_s4  ;;  %2658 = vrcp.f32 %v300_v62 }
  0xfc   :  { %2660 = vrcp.f32 %v306_v0 }
 0x105   :  { %v2659_v1 = vpop.eup %2658 }
 0x106   :  { %v2661_v4 = vpop.eup %2660  ;;  %v311_v9 = vmul.f32 0.0, %v2659_v1 }
 0x107   :  { %v322_v13 = vmul.f32 0.0, %v2661_v4 }
 0x169   :  { %v314_v2 = vpop.permute.xlu0 %313 }
 0x16a   :  { %v316_v3 = vmul.f32 %v2659_v1, %v314_v2 }
 0x16c   :  { %318 = vrot.lane.b32.xlu1 %v316_v3, %s2846_s22 }
 0x16d   :  { %v325_v6 = vpop.permute.xlu0 %324 }
 0x16e   :  { %v327_v7 = vmul.f32 %v2661_v4, %v325_v6 }
 0x170   :  { %329 = vrot.lane.b32.xlu1 %v327_v7, %s2846_s22 }
 0x1de   :  { %v319_v11 = vpop.permute.xlu1 %318 }
 0x1df   :  { %v3025_v12 = vadd.f32 %v319_v11, %v311_v9 }
 0x1e1   :  { %2662 = vtanh.f32 %v3025_v12  ;;  %v531_v60 = vrot.slane %v3025_v12, 7  ;;  %v3085_v12 = vsub.s32 7, %v2996_v40 }
 0x1e2   :  { %v330_v14 = vpop.permute.xlu1 %329 }
 0x1e3   :  { %v3028_v15 = vadd.f32 %v330_v14, %v322_v13 }
 0x1e5   :  { %2664 = vtanh.f32 %v3028_v15  ;;  %v545_v0 = vrot.slane %v3028_v15, 1 }
 0x1eb   :  { %v2663_v17 = vpop.eup %2662 }
 0x1ec   :  { %335 = vrot.lane.b32.xlu0 %v2663_v17, %s2845_s4  ;;  %v579_v17 = vsub.s32 6, %v2996_v40 }
 0x1ef   :  { %v2665_v18 = vpop.eup %2664 }
 0x1f0   :  { %341 = vrot.lane.b32.xlu1 %v2665_v18, %s2845_s4 }
 0x25e   :  { %v336_v20 = vpop.permute.xlu0 %335 }
 0x25f   :  { %v3039_v21 = vmul.f32 %v2659_v1, %v336_v20 }
 0x261   :  { %358 = vrot.lane.b32.xlu0 %v3039_v21, %s2846_s22  ;;  %v349_v7 = vrot.slane %v3039_v21, %v2999_v43 }
 0x262   :  { %v342_v22 = vpop.permute.xlu1 %341 }
 0x263   :  { %v3043_v23 = vmul.f32 %v2661_v4, %v342_v22  ;;  %v350_v15 = vsel %vm345_vm3, %v349_v7, 0.0 }
 0x265   :  { %v437_v24 = vrot.slane %v3043_v23, 7  ;;  %v355_v18 = vrot.slane %v3043_v23, %v3085_v12 }
 0x267   :  { %438 = vrot.lane.b32.xlu1 %v437_v24, %s2846_s22 }
 0x2d3   :  { %v359_v27 = vpop.permute.xlu0 %358 }
 0x2d4   :  { %2352 = vmatmul.mubr.msk.f32.vlgmr.msra.gmra.mrb[4].mxu0 %vm148_vm2, %v359_v27  ;;  %v356_v27 = vsel %vm351_vm5, %v355_v18, 0.0 }
 0x2d5   :  { %2561 = vmatpush3.bf16.msra.mxu0 %v2905_v10  ;;  %2373 = vmatprep.mubr.msk.f32.mxu0 %vm2843_vm0, %v2844_v8 }
 0x2d6   :  { %2562 = vmatprep.subr.bf16.mxu0 %v2842_v5 }
 0x2d9   :  { %v439_v28 = vpop.permute.xlu1 %438  ;;  %2564 = vmatpush3.bf16.msra.mxu0 %v2927_v19 }
 0x2da   :  { %2363 = vmatmul.mubr.msk.f32.vlgmr.msra.gmra.mrb[4].mxu1 %vm148_vm2, %v439_v28  ;;  %2571 = vmatprep.subr.bf16.mxu0 %v2842_v5 }
 0x2db   :  { %2567 = vmatpush3.bf16.msra.mxu1 %v2955_v30  ;;  %2384 = vmatprep.mubr.msk.f32.mxu1 %vm2843_vm0, %v2844_v8 }
 0x2dc   :  { %2568 = vmatprep.subr.bf16.mxu1 %v2842_v5 }
 0x2df   :  { %2570 = vmatpush3.bf16.msra.mxu1 %v2972_v37 }
 0x2e0   :  { %2577 = vmatprep.subr.bf16.mxu1 %v2842_v5 }
 0x3a7   :  { %v428_v29 = vpop.f32.mrb[4].mxu0 }
 0x3a8   :  { %v433_v31 = vrot.slane %v428_v29, 7  ;;  %v2353_v32 = vpop.f32.mrb[5].mxu0 }
 0x3aa   :  { %v435_v33 = vadd.f32 %v433_v31, %v3014_v50 }
 0x3ac   :  { %2666 = vtanh.f32 %v435_v33  ;;  %v2201_v42 = vmul.f32 -1.442695, %v435_v33 }
 0x3ad   :  { %v508_v34 = vpop.f32.mrb[4].mxu1 }
 0x3ae   :  { %v513_v35 = vrot.slane %v508_v34, 2  ;;  %v2364_v36 = vpop.f32.mrb[5].mxu1 }
 0x3b0   :  { %v515_v38 = vadd.f32 %v513_v35, %v3017_v54 }
 0x3b2   :  { %2668 = vtanh.f32 %v515_v38  ;;  %v2202_v44 = vmul.f32 -1.442695, %v515_v38 }
 0x3b3   :  { %2670 = vpow2.f32 %v2201_v42 }
 0x3b4   :  { %2672 = vpow2.f32 %v2202_v44 }
 0x3b6   :  { %v2667_v39 = vpop.eup %2666 }
 0x3b7   :  { %535 = vrot.lane.b32.xlu0 %v2667_v39, %s2845_s4 }
 0x3bc   :  { %v2669_v41 = vpop.eup %2668 }
 0x3bd   :  { %549 = vrot.lane.b32.xlu1 %v2669_v41, %s2845_s4  ;;  %v2671_v48 = vpop.eup %2670 }
 0x3be   :  { %v519_v49 = vadd.f32 1.0, %v2671_v48  ;;  %v2673_v51 = vpop.eup %2672 }
 0x3bf   :  { %v525_v52 = vadd.f32 1.0, %v2673_v51 }
 0x3c0   :  { %2674 = vrcp.f32 %v519_v49 }
 0x3c1   :  { %2676 = vrcp.f32 %v525_v52 }
 0x3ca   :  { %v2675_v53 = vpop.eup %2674 }
 0x3cb   :  { %v2677_v57 = vpop.eup %2676  ;;  %v533_v61 = vmul.f32 %v2675_v53, %v531_v60 }
 0x3cc   :  { %v547_v1 = vmul.f32 %v2677_v57, %v545_v0 }
 0x429   :  { %v536_v55 = vpop.permute.xlu0 %535 }
 0x42a   :  { %v538_v56 = vmul.f32 %v2675_v53, %v536_v55 }
 0x42c   :  { %540 = vrot.lane.b32.xlu0 %v538_v56, %s2846_s22 }
 0x42f   :  { %v550_v58 = vpop.permute.xlu1 %549 }
 0x430   :  { %v552_v59 = vmul.f32 %v2677_v57, %v550_v58 }
 0x432   :  { %554 = vrot.lane.b32.xlu1 %v552_v59, %s2846_s22 }
 0x49e   :  { %v541_v62 = vpop.permute.xlu0 %540 }
 0x49f   :  { %v3072_v63 = vadd.f32 %v541_v62, %v533_v61 }
 0x4a1   :  { %2678 = vtanh.f32 %v3072_v63  ;;  %v757_v61 = vrot.slane %v3072_v63, 7  ;;  %v799_v63 = vsub.s32 2, %v2996_v40 }
 0x4a4   :  { %v555_v2 = vpop.permute.xlu1 %554 }
 0x4a5   :  { %v3076_v3 = vadd.f32 %v555_v2, %v547_v1 }
 0x4a7   :  { %2680 = vtanh.f32 %v3076_v3  ;;  %v771_v2 = vrot.slane %v3076_v3, 1 }
 0x4ab   :  { %v2679_v4 = vpop.eup %2678 }
 0x4ac   :  { %560 = vrot.lane.b32.xlu0 %v2679_v4, %s2845_s4 }
 0x4b1   :  { %v2681_v6 = vpop.eup %2680 }
 0x4b2   :  { %566 = vrot.lane.b32.xlu1 %v2681_v6, %s2845_s4 }
 0x51e   :  { %v561_v9 = vpop.permute.xlu0 %560 }
 0x51f   :  { %v563_v11 = vmul.f32 %v2675_v53, %v561_v9 }
 0x521   :  { %v574_v13 = vrot.slane %v563_v11, %v3005_v45  ;;  %v583_v14 = vrot.slane %v563_v11, 1 }
 0x523   :  { %v3093_v16 = vsel %vm570_vm4, %v574_v13, %v350_v15  ;;  %584 = vrot.lane.b32.xlu0 %v583_v14, %s2846_s22 }
 0x524   :  { %v567_v20 = vpop.permute.xlu1 %566 }
 0x525   :  { %v569_v21 = vmul.f32 %v2677_v57, %v567_v20  ;;  %v805_v20 = vsub.s32 5, %v2996_v40 }
 0x527   :  { %v580_v22 = vrot.slane %v569_v21, %v579_v17  ;;  %v663_v24 = vrot.slane %v569_v21, 6 }
 0x529   :  { %664 = vrot.lane.b32.xlu1 %v663_v24, %s2846_s22  ;;  %v3108_v28 = vsel %vm576_vm6, %v580_v22, %v356_v27 }
 0x595   :  { %v585_v23 = vpop.permute.xlu0 %584 }
 0x596   :  { %2374 = vmatmul.mubr.msk.f32.vlgmr.msra.gmra.mrb[6].mxu0 %vm148_vm2, %v585_v23 }
 0x597   :  { %2573 = vmatpush3.bf16.msra.mxu0 %v2905_v10  ;;  %2395 = vmatprep.mubr.msk.f32.mxu0 %vm2843_vm0, %v2844_v8 }
 0x598   :  { %2574 = vmatprep.subr.bf16.mxu0 %v2842_v5 }
 0x59b   :  { %v665_v29 = vpop.permute.xlu1 %664  ;;  %2576 = vmatpush3.bf16.msra.mxu0 %v2927_v19 }
 0x59c   :  { %2385 = vmatmul.mubr.msk.f32.vlgmr.msra.gmra.mrb[6].mxu1 %vm148_vm2, %v665_v29  ;;  %2583 = vmatprep.subr.bf16.mxu0 %v2842_v5 }
 0x59d   :  { %2579 = vmatpush3.bf16.msra.mxu1 %v2955_v30  ;;  %2406 = vmatprep.mubr.msk.f32.mxu1 %vm2843_vm0, %v2844_v8 }
 0x59e   :  { %2580 = vmatprep.subr.bf16.mxu1 %v2842_v5 }
 0x5a1   :  { %2582 = vmatpush3.bf16.msra.mxu1 %v2972_v37 }
 0x5a2   :  { %2589 = vmatprep.subr.bf16.mxu1 %v2842_v5 }
 0x669   :  { %v654_v31 = vpop.f32.mrb[6].mxu0 }
 0x66a   :  { %v659_v32 = vrot.slane %v654_v31, 6  ;;  %v2375_v33 = vpop.f32.mrb[7].mxu0 }
 0x66c   :  { %v661_v34 = vadd.f32 %v659_v32, %v3014_v50 }
 0x66e   :  { %2682 = vtanh.f32 %v661_v34  ;;  %v2205_v44 = vmul.f32 -1.442695, %v661_v34 }
 0x66f   :  { %v734_v35 = vpop.f32.mrb[6].mxu1 }
 0x670   :  { %v739_v36 = vrot.slane %v734_v35, 3  ;;  %v2386_v38 = vpop.f32.mrb[7].mxu1 }
 0x672   :  { %v741_v39 = vadd.f32 %v739_v36, %v3017_v54 }
 0x674   :  { %2684 = vtanh.f32 %v741_v39  ;;  %v2206_v48 = vmul.f32 -1.442695, %v741_v39 }
 0x675   :  { %2686 = vpow2.f32 %v2205_v44 }
 0x676   :  { %2688 = vpow2.f32 %v2206_v48 }
 0x678   :  { %v2683_v41 = vpop.eup %2682 }
 0x679   :  { %761 = vrot.lane.b32.xlu0 %v2683_v41, %s2845_s4 }
 0x67e   :  { %v2685_v42 = vpop.eup %2684 }
 0x67f   :  { %775 = vrot.lane.b32.xlu1 %v2685_v42, %s2845_s4  ;;  %v2687_v49 = vpop.eup %2686 }
 0x680   :  { %v745_v51 = vadd.f32 1.0, %v2687_v49  ;;  %v2689_v52 = vpop.eup %2688 }
 0x681   :  { %v751_v53 = vadd.f32 1.0, %v2689_v52 }
 0x682   :  { %2690 = vrcp.f32 %v745_v51 }
 0x683   :  { %2692 = vrcp.f32 %v751_v53 }
 0x68c   :  { %v2691_v55 = vpop.eup %2690 }
 0x68d   :  { %v2693_v58 = vpop.eup %2692  ;;  %v759_v62 = vmul.f32 %v2691_v55, %v757_v61 }
 0x68e   :  { %v773_v4 = vmul.f32 %v2693_v58, %v771_v2 }
 0x6eb   :  { %v762_v56 = vpop.permute.xlu0 %761 }
 0x6ec   :  { %v764_v57 = vmul.f32 %v2691_v55, %v762_v56 }
 0x6ee   :  { %766 = vrot.lane.b32.xlu0 %v764_v57, %s2846_s22 }
 0x6f1   :  { %v776_v59 = vpop.permute.xlu1 %775 }
 0x6f2   :  { %v778_v60 = vmul.f32 %v2693_v58, %v776_v59 }
 0x6f4   :  { %780 = vrot.lane.b32.xlu1 %v778_v60, %s2846_s22 }
 0x760   :  { %v767_v0 = vpop.permute.xlu0 %766 }
 0x761   :  { %v3131_v1 = vadd.f32 %v767_v0, %v759_v62 }
 0x763   :  { %2694 = vtanh.f32 %v3131_v1  ;;  %v983_v60 = vrot.slane %v3131_v1, 7  ;;  %v1025_v1 = vsub.s32 3, %v2996_v40 }
 0x766   :  { %v781_v6 = vpop.permute.xlu1 %780 }
 0x767   :  { %v3135_v7 = vadd.f32 %v781_v6, %v773_v4 }
 0x769   :  { %2696 = vtanh.f32 %v3135_v7  ;;  %v997_v2 = vrot.slane %v3135_v7, 1 }
 0x76d   :  { %v2695_v9 = vpop.eup %2694 }
 0x76e   :  { %786 = vrot.lane.b32.xlu0 %v2695_v9, %s2845_s4 }
 0x773   :  { %v2697_v11 = vpop.eup %2696 }
 0x774   :  { %792 = vrot.lane.b32.xlu1 %v2697_v11, %s2845_s4 }
 0x7e0   :  { %v787_v13 = vpop.permute.xlu0 %786 }
 0x7e1   :  { %v789_v14 = vmul.f32 %v2691_v55, %v787_v13 }
 0x7e3   :  { %v800_v3 = vrot.slane %v789_v14, %v799_v63  ;;  %v809_v15 = vrot.slane %v789_v14, 2 }
 0x7e5   :  { %v3147_v18 = vsel %vm796_vm7, %v800_v3, %v3093_v16  ;;  %810 = vrot.lane.b32.xlu0 %v809_v15, %s2846_s22 }
 0x7e6   :  { %v793_v21 = vpop.permute.xlu1 %792 }
 0x7e7   :  { %v795_v22 = vmul.f32 %v2693_v58, %v793_v21 }
 0x7e9   :  { %v806_v24 = vrot.slane %v795_v22, %v805_v20  ;;  %v889_v27 = vrot.slane %v795_v22, 5  ;;  %v1031_v22 = vsub.s32 4, %v2996_v40 }
 0x7eb   :  { %890 = vrot.lane.b32.xlu1 %v889_v27, %s2846_s22  ;;  %v3158_v23 = vsel %vm802_vm8, %v806_v24, %v3108_v28 }
 0x857   :  { %v811_v16 = vpop.permute.xlu0 %810 }
 0x858   :  { %2396 = vmatmul.mubr.msk.f32.vlgmr.msra.gmra.mrb[8].mxu0 %vm148_vm2, %v811_v16 }
 0x859   :  { %2585 = vmatpush3.bf16.msra.mxu0 %v2905_v10  ;;  %2417 = vmatprep.mubr.msk.f32.mxu0 %vm2843_vm0, %v2844_v8 }
 0x85a   :  { %2586 = vmatprep.subr.bf16.mxu0 %v2842_v5 }
 0x85d   :  { %v891_v29 = vpop.permute.xlu1 %890  ;;  %2588 = vmatpush3.bf16.msra.mxu0 %v2927_v19 }
 0x85e   :  { %2407 = vmatmul.mubr.msk.f32.vlgmr.msra.gmra.mrb[8].mxu1 %vm148_vm2, %v891_v29  ;;  %2595 = vmatprep.subr.bf16.mxu0 %v2842_v5 }
 0x85f   :  { %2591 = vmatpush3.bf16.msra.mxu1 %v2955_v30  ;;  %2428 = vmatprep.mubr.msk.f32.mxu1 %vm2843_vm0, %v2844_v8 }
 0x860   :  { %2592 = vmatprep.subr.bf16.mxu1 %v2842_v5 }
 0x863   :  { %2594 = vmatpush3.bf16.msra.mxu1 %v2972_v37 }
 0x864   :  { %2601 = vmatprep.subr.bf16.mxu1 %v2842_v5 }
 0x92b   :  { %v880_v28 = vpop.f32.mrb[8].mxu0 }
 0x92c   :  { %v885_v31 = vrot.slane %v880_v28, 5  ;;  %v2397_v32 = vpop.f32.mrb[9].mxu0 }
 0x92e   :  { %v887_v33 = vadd.f32 %v885_v31, %v3014_v50 }
 0x930   :  { %2698 = vtanh.f32 %v887_v33  ;;  %v2209_v42 = vmul.f32 -1.442695, %v887_v33 }
 0x931   :  { %v960_v34 = vpop.f32.mrb[8].mxu1 }
 0x932   :  { %v965_v35 = vrot.slane %v960_v34, 4  ;;  %v2408_v36 = vpop.f32.mrb[9].mxu1 }
 0x934   :  { %v967_v38 = vadd.f32 %v965_v35, %v3017_v54 }
 0x936   :  { %2700 = vtanh.f32 %v967_v38  ;;  %v2210_v44 = vmul.f32 -1.442695, %v967_v38 }
 0x937   :  { %2702 = vpow2.f32 %v2209_v42 }
 0x938   :  { %2704 = vpow2.f32 %v2210_v44 }
 0x93a   :  { %v2699_v39 = vpop.eup %2698 }
 0x93b   :  { %987 = vrot.lane.b32.xlu0 %v2699_v39, %s2845_s4 }
 0x940   :  { %v2701_v41 = vpop.eup %2700 }
 0x941   :  { %1001 = vrot.lane.b32.xlu1 %v2701_v41, %s2845_s4  ;;  %v2703_v48 = vpop.eup %2702 }
 0x942   :  { %v971_v49 = vadd.f32 1.0, %v2703_v48  ;;  %v2705_v51 = vpop.eup %2704 }
 0x943   :  { %v977_v52 = vadd.f32 1.0, %v2705_v51 }
 0x944   :  { %2706 = vrcp.f32 %v971_v49 }
 0x945   :  { %2708 = vrcp.f32 %v977_v52 }
 0x94e   :  { %v2707_v53 = vpop.eup %2706 }
 0x94f   :  { %v2709_v57 = vpop.eup %2708  ;;  %v985_v61 = vmul.f32 %v2707_v53, %v983_v60 }
 0x950   :  { %v999_v4 = vmul.f32 %v2709_v57, %v997_v2 }
 0x9ad   :  { %v988_v55 = vpop.permute.xlu0 %987 }
 0x9ae   :  { %v990_v56 = vmul.f32 %v2707_v53, %v988_v55 }
 0x9b0   :  { %992 = vrot.lane.b32.xlu0 %v990_v56, %s2846_s22 }
 0x9b3   :  { %v1002_v58 = vpop.permute.xlu1 %1001 }
 0x9b4   :  { %v1004_v59 = vmul.f32 %v2709_v57, %v1002_v58 }
 0x9b6   :  { %1006 = vrot.lane.b32.xlu1 %v1004_v59, %s2846_s22 }
 0xa22   :  { %v993_v62 = vpop.permute.xlu0 %992 }
 0xa23   :  { %v3181_v0 = vadd.f32 %v993_v62, %v985_v61 }
 0xa25   :  { %2710 = vtanh.f32 %v3181_v0  ;;  %v1209_v61 = vrot.slane %v3181_v0, 7 }
 0xa28   :  { %v1007_v6 = vpop.permute.xlu1 %1006 }
 0xa29   :  { %v3185_v9 = vadd.f32 %v1007_v6, %v999_v4 }
 0xa2b   :  { %2712 = vtanh.f32 %v3185_v9  ;;  %v1223_v6 = vrot.slane %v3185_v9, 1 }
 0xa2f   :  { %v2711_v11 = vpop.eup %2710 }
 0xa30   :  { %1012 = vrot.lane.b32.xlu0 %v2711_v11, %s2845_s4 }
 0xa35   :  { %v2713_v13 = vpop.eup %2712 }
 0xa36   :  { %1018 = vrot.lane.b32.xlu1 %v2713_v13, %s2845_s4 }
 0xaa2   :  { %v1013_v14 = vpop.permute.xlu0 %1012 }
 0xaa3   :  { %v1015_v3 = vmul.f32 %v2707_v53, %v1013_v14 }
 0xaa5   :  { %v1026_v7 = vrot.slane %v1015_v3, %v1025_v1  ;;  %v1035_v15 = vrot.slane %v1015_v3, 3 }
 0xaa7   :  { %v3197_v21 = vsel %vm1022_vm9, %v1026_v7, %v3147_v18  ;;  %1036 = vrot.lane.b32.xlu0 %v1035_v15, %s2846_s22 }
 0xaa8   :  { %v1019_v24 = vpop.permute.xlu1 %1018 }
 0xaa9   :  { %v1021_v27 = vmul.f32 %v2709_v57, %v1019_v24 }
 0xaab   :  { %v1032_v16 = vrot.slane %v1021_v27, %v1031_v22  ;;  %v1115_v29 = vrot.slane %v1021_v27, 4 }
 0xaad   :  { %1116 = vrot.lane.b32.xlu1 %v1115_v29, %s2846_s22  ;;  %v3208_v28 = vsel %vm1028_vm10, %v1032_v16, %v3158_v23 }
 0xb19   :  { %v1037_v18 = vpop.permute.xlu0 %1036 }
 0xb1a   :  { %2418 = vmatmul.mubr.msk.f32.vlgmr.msra.gmra.mrb[10].mxu0 %vm148_vm2, %v1037_v18 }
 0xb1b   :  { %2597 = vmatpush3.bf16.msra.mxu0 %v2905_v10  ;;  %2439 = vmatprep.mubr.msk.f32.mxu0 %vm2843_vm0, %v2844_v8 }
 0xb1c   :  { %2598 = vmatprep.subr.bf16.mxu0 %v2842_v5 }
 0xb1f   :  { %v1117_v31 = vpop.permute.xlu1 %1116  ;;  %2600 = vmatpush3.bf16.msra.mxu0 %v2927_v19 }
 0xb20   :  { %2429 = vmatmul.mubr.msk.f32.vlgmr.msra.gmra.mrb[10].mxu1 %vm148_vm2, %v1117_v31  ;;  %2607 = vmatprep.subr.bf16.mxu0 %v2842_v5 }
 0xb21   :  { %2603 = vmatpush3.bf16.msra.mxu1 %v2955_v30  ;;  %2450 = vmatprep.mubr.msk.f32.mxu1 %vm2843_vm0, %v2844_v8 }
 0xb22   :  { %2604 = vmatprep.subr.bf16.mxu1 %v2842_v5 }
 0xb25   :  { %2606 = vmatpush3.bf16.msra.mxu1 %v2972_v37 }
 0xb26   :  { %2613 = vmatprep.subr.bf16.mxu1 %v2842_v5 }
 0xbed   :  { %v1106_v23 = vpop.f32.mrb[10].mxu0 }
 0xbee   :  { %v1111_v32 = vrot.slane %v1106_v23, 4  ;;  %v2419_v33 = vpop.f32.mrb[11].mxu0 }
 0xbf0   :  { %v1113_v34 = vadd.f32 %v1111_v32, %v3014_v50 }
 0xbf2   :  { %2714 = vtanh.f32 %v1113_v34  ;;  %v2213_v44 = vmul.f32 -1.442695, %v1113_v34 }
 0xbf3   :  { %v1186_v35 = vpop.f32.mrb[10].mxu1 }
 0xbf4   :  { %v1191_v36 = vrot.slane %v1186_v35, 5  ;;  %v2430_v38 = vpop.f32.mrb[11].mxu1 }
 0xbf6   :  { %v1193_v39 = vadd.f32 %v1191_v36, %v3017_v54 }
 0xbf8   :  { %2716 = vtanh.f32 %v1193_v39  ;;  %v2214_v48 = vmul.f32 -1.442695, %v1193_v39 }
 0xbf9   :  { %2718 = vpow2.f32 %v2213_v44 }
 0xbfa   :  { %2720 = vpow2.f32 %v2214_v48 }
 0xbfc   :  { %v2715_v41 = vpop.eup %2714 }
 0xbfd   :  { %1213 = vrot.lane.b32.xlu0 %v2715_v41, %s2845_s4 }
 0xc02   :  { %v2717_v42 = vpop.eup %2716 }
 0xc03   :  { %1227 = vrot.lane.b32.xlu1 %v2717_v42, %s2845_s4  ;;  %v2719_v49 = vpop.eup %2718 }
 0xc04   :  { %v1197_v51 = vadd.f32 1.0, %v2719_v49  ;;  %v2721_v52 = vpop.eup %2720 }
 0xc05   :  { %v1203_v53 = vadd.f32 1.0, %v2721_v52 }
 0xc06   :  { %2722 = vrcp.f32 %v1197_v51 }
 0xc07   :  { %2724 = vrcp.f32 %v1203_v53 }
 0xc10   :  { %v2723_v55 = vpop.eup %2722 }
 0xc11   :  { %v2725_v58 = vpop.eup %2724  ;;  %v1211_v62 = vmul.f32 %v2723_v55, %v1209_v61 }
 0xc12   :  { %v1225_v11 = vmul.f32 %v2725_v58, %v1223_v6 }
 0xc6f   :  { %v1214_v56 = vpop.permute.xlu0 %1213 }
 0xc70   :  { %v1216_v57 = vmul.f32 %v2723_v55, %v1214_v56 }
 0xc72   :  { %1218 = vrot.lane.b32.xlu0 %v1216_v57, %s2846_s22 }
 0xc75   :  { %v1228_v59 = vpop.permute.xlu1 %1227 }
 0xc76   :  { %v1230_v60 = vmul.f32 %v2725_v58, %v1228_v59 }
 0xc78   :  { %1232 = vrot.lane.b32.xlu1 %v1230_v60, %s2846_s22 }
 0xce4   :  { %v1219_v2 = vpop.permute.xlu0 %1218 }
 0xce5   :  { %v3231_v4 = vadd.f32 %v1219_v2, %v1211_v62 }
 0xce7   :  { %2726 = vtanh.f32 %v3231_v4  ;;  %v1433_v60 = vrot.slane %v3231_v4, 7 }
 0xcea   :  { %v1233_v13 = vpop.permute.xlu1 %1232 }
 0xceb   :  { %v3235_v14 = vadd.f32 %v1233_v13, %v1225_v11 }
 0xced   :  { %2728 = vtanh.f32 %v3235_v14  ;;  %v1447_v6 = vrot.slane %v3235_v14, 1 }
 0xcf1   :  { %v2727_v3 = vpop.eup %2726 }
 0xcf2   :  { %1238 = vrot.lane.b32.xlu0 %v2727_v3, %s2845_s4 }
 0xcf7   :  { %v2729_v7 = vpop.eup %2728 }
 0xcf8   :  { %1244 = vrot.lane.b32.xlu1 %v2729_v7, %s2845_s4 }
 0xd64   :  { %v1239_v0 = vpop.permute.xlu0 %1238 }
 0xd65   :  { %v1241_v15 = vmul.f32 %v2723_v55, %v1239_v0 }
 0xd67   :  { %v1251_v24 = vrot.slane %v1241_v15, %v1031_v22  ;;  %v1259_v9 = vrot.slane %v1241_v15, 4 }
 0xd69   :  { %v3245_v27 = vsel %vm1028_vm10, %v1251_v24, %v3197_v21  ;;  %1260 = vrot.lane.b32.xlu0 %v1259_v9, %s2846_s22 }
 0xd6a   :  { %v1245_v16 = vpop.permute.xlu1 %1244 }
 0xd6b   :  { %v1247_v29 = vmul.f32 %v2725_v58, %v1245_v16 }
 0xd6d   :  { %v1256_v18 = vrot.slane %v1247_v29, %v1025_v1  ;;  %v1339_v31 = vrot.slane %v1247_v29, 3 }
 0xd6f   :  { %1340 = vrot.lane.b32.xlu1 %v1339_v31, %s2846_s22  ;;  %v3254_v22 = vsel %vm1022_vm9, %v1256_v18, %v3208_v28 }
 0xddb   :  { %v1261_v23 = vpop.permute.xlu0 %1260 }
 0xddc   :  { %2440 = vmatmul.mubr.msk.f32.vlgmr.msra.gmra.mrb[12].mxu0 %vm148_vm2, %v1261_v23 }
 0xddd   :  { %2609 = vmatpush3.bf16.msra.mxu0 %v2905_v10  ;;  %2461 = vmatprep.mubr.msk.f32.mxu0 %vm2843_vm0, %v2844_v8 }
 0xdde   :  { %2610 = vmatprep.subr.bf16.mxu0 %v2842_v5 }
 0xde1   :  { %v1341_v21 = vpop.permute.xlu1 %1340  ;;  %2612 = vmatpush3.bf16.msra.mxu0 %v2927_v19 }
 0xde2   :  { %2451 = vmatmul.mubr.msk.f32.vlgmr.msra.gmra.mrb[12].mxu1 %vm148_vm2, %v1341_v21  ;;  %2619 = vmatprep.subr.bf16.mxu0 %v2842_v5 }
 0xde3   :  { %2615 = vmatpush3.bf16.msra.mxu1 %v2955_v30  ;;  %2472 = vmatprep.mubr.msk.f32.mxu1 %vm2843_vm0, %v2844_v8 }
 0xde4   :  { %2616 = vmatprep.subr.bf16.mxu1 %v2842_v5 }
 0xde7   :  { %2618 = vmatpush3.bf16.msra.mxu1 %v2972_v37 }
 0xde8   :  { %2625 = vmatprep.subr.bf16.mxu1 %v2842_v5 }
 0xeaf   :  { %v1330_v1 = vpop.f32.mrb[12].mxu0 }
 0xeb0   :  { %v1335_v28 = vrot.slane %v1330_v1, 3  ;;  %v2441_v32 = vpop.f32.mrb[13].mxu0 }
 0xeb2   :  { %v1337_v33 = vadd.f32 %v1335_v28, %v3014_v50 }
 0xeb4   :  { %2730 = vtanh.f32 %v1337_v33  ;;  %v2217_v42 = vmul.f32 -1.442695, %v1337_v33 }
 0xeb5   :  { %v1410_v34 = vpop.f32.mrb[12].mxu1 }
 0xeb6   :  { %v1415_v35 = vrot.slane %v1410_v34, 6  ;;  %v2452_v36 = vpop.f32.mrb[13].mxu1 }
 0xeb8   :  { %v1417_v38 = vadd.f32 %v1415_v35, %v3017_v54 }
 0xeba   :  { %2732 = vtanh.f32 %v1417_v38  ;;  %v2218_v44 = vmul.f32 -1.442695, %v1417_v38 }
 0xebb   :  { %2734 = vpow2.f32 %v2217_v42 }
 0xebc   :  { %2736 = vpow2.f32 %v2218_v44 }
 0xebe   :  { %v2731_v39 = vpop.eup %2730 }
 0xebf   :  { %1437 = vrot.lane.b32.xlu0 %v2731_v39, %s2845_s4 }
 0xec4   :  { %v2733_v41 = vpop.eup %2732 }
 0xec5   :  { %1451 = vrot.lane.b32.xlu1 %v2733_v41, %s2845_s4  ;;  %v2735_v48 = vpop.eup %2734 }
 0xec6   :  { %v1421_v49 = vadd.f32 1.0, %v2735_v48  ;;  %v2737_v51 = vpop.eup %2736 }
 0xec7   :  { %v1427_v52 = vadd.f32 1.0, %v2737_v51 }
 0xec8   :  { %2738 = vrcp.f32 %v1421_v49 }
 0xec9   :  { %2740 = vrcp.f32 %v1427_v52 }
 0xed2   :  { %v2739_v53 = vpop.eup %2738 }
 0xed3   :  { %v2741_v57 = vpop.eup %2740  ;;  %v1435_v61 = vmul.f32 %v2739_v53, %v1433_v60 }
 0xed4   :  { %v1449_v11 = vmul.f32 %v2741_v57, %v1447_v6 }
 0xf31   :  { %v1438_v55 = vpop.permute.xlu0 %1437 }
 0xf32   :  { %v1440_v56 = vmul.f32 %v2739_v53, %v1438_v55 }
 0xf34   :  { %1442 = vrot.lane.b32.xlu0 %v1440_v56, %s2846_s22 }
 0xf37   :  { %v1452_v58 = vpop.permute.xlu1 %1451 }
 0xf38   :  { %v1454_v59 = vmul.f32 %v2741_v57, %v1452_v58 }
 0xf3a   :  { %1456 = vrot.lane.b32.xlu1 %v1454_v59, %s2846_s22 }
 0xfa6   :  { %v1443_v62 = vpop.permute.xlu0 %1442 }
 0xfa7   :  { %v3277_v2 = vadd.f32 %v1443_v62, %v1435_v61 }
 0xfa9   :  { %2742 = vtanh.f32 %v3277_v2 }
 0xfac   :  { %v1457_v13 = vpop.permute.xlu1 %1456 }
 0xfad   :  { %v3281_v3 = vadd.f32 %v1457_v13, %v1449_v11 }
 0xfaf   :  { %2744 = vtanh.f32 %v3281_v3  ;;  %v1671_v61 = vrot.slane %v3281_v3, 1 }
 0xfb3   :  { %v2743_v7 = vpop.eup %2742 }
 0xfb4   :  { %1462 = vrot.lane.b32.xlu0 %v2743_v7, %s2845_s4 }
 0xfb9   :  { %v2745_v0 = vpop.eup %2744 }
 0xfba   :  { %1468 = vrot.lane.b32.xlu1 %v2745_v0, %s2845_s4 }
0x1026   :  { %v1463_v4 = vpop.permute.xlu0 %1462 }
0x1027   :  { %v1465_v15 = vmul.f32 %v2739_v53, %v1463_v4 }
0x1029   :  { %v1475_v24 = vrot.slane %v1465_v15, %v805_v20  ;;  %v1483_v14 = vrot.slane %v1465_v15, 5 }
0x102b   :  { %1484 = vrot.lane.b32.xlu0 %v1483_v14, %s2846_s22  ;;  %v3292_v9 = vsel %vm802_vm8, %v1475_v24, %v3245_v27 }
0x102c   :  { %v1469_v16 = vpop.permute.xlu1 %1468 }
0x102d   :  { %v1471_v29 = vmul.f32 %v2741_v57, %v1469_v16  ;;  %v1657_v57 = vrot.slane %v3277_v2, 7 }
0x102f   :  { %v1480_v18 = vrot.slane %v1471_v29, %v799_v63  ;;  %v1563_v31 = vrot.slane %v1471_v29, 2 }
0x1031   :  { %1564 = vrot.lane.b32.xlu1 %v1563_v31, %s2846_s22  ;;  %v3300_v20 = vsel %vm796_vm7, %v1480_v18, %v3254_v22 }
0x109d   :  { %v1485_v23 = vpop.permute.xlu0 %1484 }
0x109e   :  { %2462 = vmatmul.mubr.msk.f32.vlgmr.msra.gmra.mrb[14].mxu0 %vm148_vm2, %v1485_v23 }
0x109f   :  { %2621 = vmatpush3.bf16.msra.mxu0 %v2905_v10  ;;  %2483 = vmatprep.mubr.msk.f32.mxu0 %vm2843_vm0, %v2844_v8 }
0x10a0   :  { %2622 = vmatprep.subr.bf16.mxu0 %v2842_v5 }
0x10a3   :  { %v1565_v27 = vpop.permute.xlu1 %1564  ;;  %2624 = vmatpush3.bf16.msra.mxu0 %v2927_v19 }
0x10a4   :  { %2473 = vmatmul.mubr.msk.f32.vlgmr.msra.gmra.mrb[14].mxu1 %vm148_vm2, %v1565_v27  ;;  %2631 = vmatprep.subr.bf16.mxu0 %v2842_v5 }
0x10a5   :  { %2627 = vmatpush3.bf16.msra.mxu1 %v2955_v30  ;;  %2494 = vmatprep.mubr.msk.f32.mxu1 %vm2843_vm0, %v2844_v8 }
0x10a6   :  { %2628 = vmatprep.subr.bf16.mxu1 %v2842_v5 }
0x10a9   :  { %2630 = vmatpush3.bf16.msra.mxu1 %v2972_v37 }
0x10aa   :  { %2637 = vmatprep.subr.bf16.mxu1 %v2842_v5 }
0x1171   :  { %v1554_v63 = vpop.f32.mrb[14].mxu0 }
0x1172   :  { %v1559_v22 = vrot.slane %v1554_v63, 2  ;;  %v2463_v21 = vpop.f32.mrb[15].mxu0 }
0x1174   :  { %v1561_v1 = vadd.f32 %v1559_v22, %v3014_v50 }
0x1176   :  { %2746 = vtanh.f32 %v1561_v1  ;;  %v2221_v38 = vmul.f32 -1.442695, %v1561_v1 }
0x1177   :  { %v1634_v28 = vpop.f32.mrb[14].mxu1 }
0x1178   :  { %v1639_v32 = vrot.slane %v1634_v28, 7  ;;  %v2474_v33 = vpop.f32.mrb[15].mxu1 }
0x117a   :  { %v1641_v34 = vadd.f32 %v1639_v32, %v3017_v54 }
0x117c   :  { %2748 = vtanh.f32 %v1641_v34  ;;  %v2222_v39 = vmul.f32 -1.442695, %v1641_v34 }
0x117d   :  { %2750 = vpow2.f32 %v2221_v38 }
0x117e   :  { %2752 = vpow2.f32 %v2222_v39 }
0x1180   :  { %v2747_v35 = vpop.eup %2746 }
0x1181   :  { %1661 = vrot.lane.b32.xlu0 %v2747_v35, %s2845_s4 }
0x1186   :  { %v2749_v36 = vpop.eup %2748 }
0x1187   :  { %1675 = vrot.lane.b32.xlu1 %v2749_v36, %s2845_s4  ;;  %v2751_v41 = vpop.eup %2750 }
0x1188   :  { %v1645_v42 = vadd.f32 1.0, %v2751_v41  ;;  %v2753_v44 = vpop.eup %2752 }
0x1189   :  { %v1651_v48 = vadd.f32 1.0, %v2753_v44 }
0x118a   :  { %2754 = vrcp.f32 %v1645_v42 }
0x118b   :  { %2756 = vrcp.f32 %v1651_v48 }
0x1194   :  { %v2755_v49 = vpop.eup %2754 }
0x1195   :  { %v2757_v53 = vpop.eup %2756  ;;  %v1659_v58 = vmul.f32 %v2755_v49, %v1657_v57 }
0x1196   :  { %v1673_v62 = vmul.f32 %v2757_v53, %v1671_v61 }
0x11f3   :  { %v1662_v51 = vpop.permute.xlu0 %1661 }
0x11f4   :  { %v1664_v52 = vmul.f32 %v2755_v49, %v1662_v51 }
0x11f6   :  { %1666 = vrot.lane.b32.xlu0 %v1664_v52, %s2846_s22 }
0x11f9   :  { %v1676_v55 = vpop.permute.xlu1 %1675 }
0x11fa   :  { %v1678_v56 = vmul.f32 %v2757_v53, %v1676_v55 }
0x11fc   :  { %1680 = vrot.lane.b32.xlu1 %v1678_v56, %s2846_s22 }
0x1268   :  { %v1667_v59 = vpop.permute.xlu0 %1666 }
0x1269   :  { %v3323_v60 = vadd.f32 %v1667_v59, %v1659_v58 }
0x126b   :  { %2758 = vtanh.f32 %v3323_v60  ;;  %v1878_v35 = vrot.slane %v3323_v60, 7 }
0x126e   :  { %v1681_v6 = vpop.permute.xlu1 %1680 }
0x126f   :  { %v3327_v11 = vadd.f32 %v1681_v6, %v1673_v62 }
0x1271   :  { %2760 = vtanh.f32 %v3327_v11  ;;  %v1892_v39 = vrot.slane %v3327_v11, 1 }
0x1275   :  { %v2759_v13 = vpop.eup %2758 }
0x1276   :  { %1686 = vrot.lane.b32.xlu0 %v2759_v13, %s2845_s4  ;;  %v144_v13 = vadd.f32 %v3047_v25, %v3008_v46 }
0x127b   :  { %v2761_v7 = vpop.eup %2760 }
0x127c   :  { %1692 = vrot.lane.b32.xlu1 %v2761_v7, %s2845_s4 }
0x12e8   :  { %v1687_v2 = vpop.permute.xlu0 %1686 }
0x12e9   :  { %v1689_v0 = vmul.f32 %v2755_v49, %v1687_v2 }
0x12eb   :  { %v1699_v4 = vrot.slane %v1689_v0, %v579_v17  ;;  %v1707_v3 = vrot.slane %v1689_v0, 6 }
0x12ed   :  { %1708 = vrot.lane.b32.xlu0 %v1707_v3, %s2846_s22  ;;  %v3338_v15 = vsel %vm576_vm6, %v1699_v4, %v3292_v9  ;;  %v146_v4 = vadd.f32 %v3049_v26, %v3011_v47 }
0x12ee   :  { %v1693_v24 = vpop.permute.xlu1 %1692 }
0x12ef   :  { %v1695_v14 = vmul.f32 %v2757_v53, %v1693_v24 }
0x12f1   :  { %v1704_v16 = vrot.slane %v1695_v14, %v3005_v45  ;;  %v1787_v29 = vrot.slane %v1695_v14, 1 }
0x12f3   :  { %1788 = vrot.lane.b32.xlu1 %v1787_v29, %s2846_s22  ;;  %v3345_v18 = vsel %vm570_vm4, %v1704_v16, %v3300_v20 }
0x135f   :  { %v1709_v17 = vpop.permute.xlu0 %1708 }
0x1360   :  { %2484 = vmatmul.mubr.msk.f32.vlgmr.msra.gmra.mrb[16].mxu0 %vm148_vm2, %v1709_v17 }
0x1361   :  { %2633 = vmatpush3.bf16.msra.mxu0 %v2905_v10  ;;  %2505 = vmatprep.mubr.msk.f32.mxu0 %vm2843_vm0, %v2844_v8 }
0x1362   :  { %2634 = vmatprep.subr.bf16.mxu0 %v2842_v5 }
0x1365   :  { %v1789_v9 = vpop.permute.xlu1 %1788  ;;  %2636 = vmatpush3.bf16.msra.mxu0 %v2927_v19 }
0x1366   :  { %2495 = vmatmul.mubr.msk.f32.vlgmr.msra.gmra.mrb[16].mxu1 %vm148_vm2, %v1789_v9 }
0x1367   :  { %2639 = vmatpush3.bf16.msra.mxu1 %v2955_v30  ;;  %2516 = vmatprep.mubr.msk.f32.mxu1 %vm2843_vm0, %v2844_v8 }
0x1368   :  { %2640 = vmatprep.subr.bf16.mxu1 %v2842_v5 }
0x136b   :  { %2642 = vmatpush3.bf16.msra.mxu1 %v2972_v37 }
0x1433   :  { %v1778_v10 = vpop.f32.mrb[16].mxu0 }
0x1434   :  { %v1783_v45 = vrot.slane %v1778_v10, 1  ;;  %v2485_v31 = vpop.f32.mrb[17].mxu0 }
0x1436   :  { %v1785_v20 = vadd.f32 %v1783_v45, %v3014_v50 }
0x1438   :  { %2762 = vtanh.f32 %v1785_v20  ;;  %v2225_v5 = vmul.f32 -1.442695, %v1785_v20 }
0x1439   :  { %v1858_v23 = vpop.f32.mrb[16].mxu1 }
0x143a   :  { %v1862_v19 = vadd.f32 %v1858_v23, %v3017_v54  ;;  %v2496_v27 = vpop.f32.mrb[17].mxu1 }
0x143c   :  { %2764 = vtanh.f32 %v1862_v19  ;;  %v2226_v8 = vmul.f32 -1.442695, %v1862_v19 }
0x143d   :  { %2766 = vpow2.f32 %v2225_v5 }
0x143e   :  { %2768 = vpow2.f32 %v2226_v8 }
0x1442   :  { %v2763_v63 = vpop.eup %2762 }
0x1443   :  { %1882 = vrot.lane.b32.xlu0 %v2763_v63, %s2845_s4 }
0x1446   :  { %v2765_v30 = vpop.eup %2764 }
0x1447   :  { %1896 = vrot.lane.b32.xlu1 %v2765_v30, %s2845_s4  ;;  %v2767_v37 = vpop.eup %2766 }
0x1448   :  { %v1866_v22 = vadd.f32 1.0, %v2767_v37  ;;  %v2769_v21 = vpop.eup %2768 }
0x1449   :  { %v1872_v50 = vadd.f32 1.0, %v2769_v21 }
0x144a   :  { %2770 = vrcp.f32 %v1866_v22 }
0x144b   :  { %2772 = vrcp.f32 %v1872_v50 }
0x1454   :  { %v2771_v1 = vpop.eup %2770 }
0x1455   :  { %v2773_v32 = vpop.eup %2772  ;;  %v1880_v36 = vmul.f32 %v2771_v1, %v1878_v35 }
0x1456   :  { %v1894_v42 = vmul.f32 %v2773_v32, %v1892_v39 }
0x14b5   :  { %v1883_v54 = vpop.permute.xlu0 %1882 }
0x14b6   :  { %v1885_v28 = vmul.f32 %v2771_v1, %v1883_v54 }
0x14b8   :  { %1887 = vrot.lane.b32.xlu0 %v1885_v28, %s2846_s22 }
0x14b9   :  { %v1897_v33 = vpop.permute.xlu1 %1896 }
0x14ba   :  { %v1899_v34 = vmul.f32 %v2773_v32, %v1897_v33 }
0x14bc   :  { %1901 = vrot.lane.b32.xlu1 %v1899_v34, %s2846_s22 }
0x152a   :  { %v1888_v38 = vpop.permute.xlu0 %1887 }
0x152b   :  { %v1890_v41 = vadd.f32 %v1888_v38, %v1880_v36 }
0x152d   :  { %2774 = vtanh.f32 %v1890_v41  ;;  %v2105_v23 = vrot.slane %v1890_v41, %v3085_v12 }
0x152e   :  { %v1902_v44 = vpop.permute.xlu1 %1901 }
0x152f   :  { %v1904_v48 = vadd.f32 %v1902_v44, %v1894_v42 }
0x1531   :  { %2776 = vtanh.f32 %v1904_v48  ;;  %v2120_v27 = vrot.slane %v1904_v48, %v2999_v43 }
0x1537   :  { %v2775_v49 = vpop.eup %2774 }
0x1538   :  { %1907 = vrot.lane.b32.xlu0 %v2775_v49, %s2845_s4 }
0x153b   :  { %v2777_v51 = vpop.eup %2776 }
0x153c   :  { %1913 = vrot.lane.b32.xlu1 %v2777_v51, %s2845_s4 }
0x15aa   :  { %v1908_v52 = vpop.permute.xlu0 %1907 }
0x15ab   :  { %v1910_v53 = vmul.f32 %v2771_v1, %v1908_v52 }
0x15ad   :  { %v1920_v55 = vrot.slane %v1910_v53, %v3085_v12  ;;  %v1928_v56 = vrot.slane %v1910_v53, 7 }
0x15ae   :  { %v1914_v57 = vpop.permute.xlu1 %1913 }
0x15af   :  { %v1916_v58 = vmul.f32 %v2773_v32, %v1914_v57  ;;  %1929 = vrot.lane.b32.xlu0 %v1928_v56, %s2846_s22  ;;  %v1921_v59 = vsel %vm351_vm5, %v1920_v55, %v3338_v15 }
0x15b1   :  { %v1925_v60 = vrot.slane %v1916_v58, %v2999_v43  ;;  %2004 = vrot.lane.b32.xlu1 %v1916_v58, %s2846_s22 }
0x15b3   :  { %v1926_v61 = vsel %vm345_vm3, %v1925_v60, %v3345_v18 }
0x1621   :  { %v1930_v62 = vpop.permute.xlu0 %1929 }
0x1622   :  { %2506 = vmatmul.mubr.msk.f32.vlgmr.msra.gmra.mrb[18].mxu0 %vm148_vm2, %v1930_v62 }
0x1623   :  { %v2005_v6 = vpop.permute.xlu1 %2004 }
0x1624   :  { %2517 = vmatmul.mubr.msk.f32.vlgmr.msra.gmra.mrb[18].mxu1 %vm148_vm2, %v2005_v6 }
0x16f5   :  { %v1999_v11 = vpop.f32.mrb[18].mxu0 }
0x16f6   :  { %v2081_v7 = vrot.slane %v1999_v11, %v2999_v43  ;;  %v2507_v2 = vpop.f32.mrb[19].mxu0 }
0x16f7   :  { %v2074_v0 = vpop.f32.mrb[18].mxu1 }
0x16f8   :  { %v2082_v3 = vadd.f32 %v2081_v7, %v144_v13  ;;  %v2086_v40 = vrot.slane %v2074_v0, %v2999_v43  ;;  %v2518_v15 = vpop.f32.mrb[19].mxu1 }
0x16fa   :  { %2778 = vtanh.f32 %v2082_v3  ;;  %v2087_v24 = vadd.f32 %v2086_v40, %v146_v4  ;;  %v2229_v46 = vmul.f32 -1.442695, %v2082_v3 }
0x16fc   :  { %2780 = vtanh.f32 %v2087_v24  ;;  %v2230_v25 = vmul.f32 -1.442695, %v2087_v24 }
0x16fd   :  { %2782 = vpow2.f32 %v2229_v46 }
0x16fe   :  { %2784 = vpow2.f32 %v2230_v25 }
0x1704   :  { %v2779_v14 = vpop.eup %2778 }
0x1705   :  { %2108 = vrot.lane.b32.xlu0 %v2779_v14, %s2845_s4 }
0x1706   :  { %v2781_v16 = vpop.eup %2780 }
0x1707   :  { %2123 = vrot.lane.b32.xlu1 %v2781_v16, %s2845_s4  ;;  %v2783_v29 = vpop.eup %2782 }
0x1708   :  { %v2785_v18 = vpop.eup %2784  ;;  %v2091_v47 = vadd.f32 1.0, %v2783_v29 }
0x1709   :  { %v2097_v26 = vadd.f32 1.0, %v2785_v18 }
0x170a   :  { %2786 = vrcp.f32 %v2091_v47 }
0x170b   :  { %2788 = vrcp.f32 %v2097_v26 }
0x1714   :  { %v2787_v17 = vpop.eup %2786 }
0x1715   :  { %v2789_v45 = vpop.eup %2788  ;;  %v2106_v19 = vmul.f32 %v2787_v17, %v2105_v23 }
0x1716   :  { %v2121_v5 = vmul.f32 %v2789_v45, %v2120_v27 }
0x1777   :  { %v2109_v9 = vpop.permute.xlu0 %2108 }
0x1778   :  { %v2111_v10 = vmul.f32 %v2787_v17, %v2109_v9 }
0x1779   :  { %v2124_v31 = vpop.permute.xlu1 %2123 }
0x177a   :  { %2113 = vrot.lane.b32.xlu0 %v2111_v10, %s2846_s22  ;;  %v2126_v20 = vmul.f32 %v2789_v45, %v2124_v31 }
0x177c   :  { %2128 = vrot.lane.b32.xlu1 %v2126_v20, %s2846_s22 }
0x17ec   :  { %v2114_v63 = vpop.permute.xlu0 %2113 }
0x17ed   :  { %v2116_v30 = vadd.f32 %v2114_v63, %v2106_v19 }
0x17ee   :  { %v2129_v8 = vpop.permute.xlu1 %2128 }
0x17ef   :  { %2790 = vtanh.f32 %v2116_v30  ;;  %v2131_v37 = vadd.f32 %v2129_v8, %v2121_v5 }
0x17f1   :  { %2792 = vtanh.f32 %v2131_v37 }
0x17f9   :  { %v2791_v22 = vpop.eup %2790 }
0x17fa   :  { %2134 = vrot.lane.b32.xlu0 %v2791_v22, %s2845_s4 }
0x17fb   :  { %v2793_v21 = vpop.eup %2792 }
0x17fc   :  { %2140 = vrot.lane.b32.xlu1 %v2793_v21, %s2845_s4 }
0x17fe   :  { %2145 = vrot.lane.b32.xlu0 %v1921_v59, %s2846_s22 }
0x1802   :  { %2150 = vrot.lane.b32.xlu0 %v1926_v61, %s2845_s4 }
0x186c   :  { %v2135_v12 = vpop.permute.xlu0 %2134 }
0x186d   :  { %v2137_v50 = vmul.f32 %v2787_v17, %v2135_v12 }
0x186e   :  { %v2141_v43 = vpop.permute.xlu1 %2140 }
0x186f   :  { %2156 = vrot.lane.b32.xlu1 %v2137_v50, %s2846_s22  ;;  %v2143_v54 = vmul.f32 %v2789_v45, %v2141_v43 }
0x1870   :  { %v2146_v1 = vpop.permute.xlu0 %2145 }
0x1871   :  { %2148 = vst.msk [vmem:[#allocation2] sm:$0xff] %vm148_vm2, %v2146_v1 }
0x1873   :  { %2162 = vrot.lane.b32.xlu1 %v2143_v54, %s2845_s4 }
0x1874   :  { %v2151_v28 = vpop.permute.xlu0 %2150 }
0x1875   :  { %2154 = vst.msk [vmem:[#allocation2] sm:$0xff] %vm2153_vm11, %v2151_v28 }
0x1876   :  { %2805 = shalt.err (!%p2802_p4)
}
0x1877   :  { %s2806_s28 = scalar_lea.hbm %s3429_s5, 128 }
0x1878   :  { %p2807_p5 = scmp.ne.s32.totalorder %s3429_s5, %s2806_s28  ;;  %p2810_p6 = scmp.lt.u32.totalorder %s2806_s28, %s3429_s5 }
0x187a   :  { %p2812_p7 = pnand %p2810_p6, %p2807_p5 }
0x187c   :  { %2815 = shalt.err (!%p2812_p7)
}
0x187d   :  { %2176 = dma.vmem_to_hbm [thread:$0]  %s2174_s25, 128, %s3429_s5, [#allocation3]   ;;  %vm2159_vm12 = vcmask 257024   ;;  %vm2165_vm13 = vcmask 519424  }
0x187e   :  { %s2848_s11 = smov [#allocation4]  }
0x187f   :  { %s2183_s12 = sshll.u32 %s2848_s11, 4  ;;  %s2184_s12 = int_to_ptr.vmem [resolvable:$true] %s2183_s12 }
0x1880   :  { %s2816_s13 = scalar_lea.vmem %s2184_s12, 64  ;;  %p2821_p9 = scmp.lt.s32.totalorder %s2184_s12, %s2184_s12 }
0x1881   :  { %p2817_p8 = scmp.ne.s32.totalorder %s2184_s12, %s2816_s13  ;;  %p2822_p10 = scmp.lt.s32.totalorder %s2816_s13, %s2816_s13 }
0x1883   :  { %p2823_p11 = por %p2822_p10, %p2821_p9 }
0x1885   :  { %p2824_p12 = pnand %p2823_p11, %p2817_p8 }
0x18e1   :  { %v2157_v32 = vpop.permute.xlu1 %2156 }
0x18e2   :  { %2160 = vst.msk [vmem:[#allocation4] sm:$0xf] %vm2159_vm12, %v2157_v32 }
0x18e5   :  { %v2163_v33 = vpop.permute.xlu1 %2162 }
0x18e6   :  { %2166 = vst.msk [vmem:[#allocation4] sm:$0xf] %vm2165_vm13, %v2163_v33 }
0x18e7   :  { %2827 = shalt.err (!%p2824_p12)
}
0x18e8   :  { %s2828_s5 = scalar_lea.hbm %s3430_s6, 64 }
0x18e9   :  { %p2829_p13 = scmp.ne.s32.totalorder %s3430_s6, %s2828_s5  ;;  %p2832_p0 = scmp.lt.u32.totalorder %s2828_s5, %s3430_s6 }
0x18eb   :  { %p2834_p1 = pnand %p2832_p0, %p2829_p13 }
0x18ed   :  { %2837 = shalt.err (!%p2834_p1)
}
0x18ee   :  { %2186 = dma.vmem_to_hbm [thread:$0]  %s2184_s12, 64, %s3430_s6, [#allocation5]  }
0x18ef   :  { %2838 = dma.done.wait [#allocation3], 128  }
0x18f0   :  { %2839 = vsyncadd [#allocation3], 4294967168 }
0x18f1   :  { %2840 = dma.done.wait [#allocation5], 64  }
0x18f2   :  { %2841 = vsyncadd [#allocation5], 4294967232 }
0x18f3   :  { %2193 = vsyncpa [#allocation3], 1 }
0x18f4   :  { %2194 = vsyncpa [#allocation5], 1 }

</bundles_post_ra>
